<compile_context>
chip_gen: v7x
topology: tpu7x:2x2x1
jax: 0.10.0
libtpu: 0.0.40
codegen_flags: <defaults>
</compile_context>

<pallas_src>
import functools

import jax
import jax.numpy as jnp
from jax import lax
from jax.experimental import pallas as pl
from jax.experimental.pallas import tpu as pltpu


def attention_layer_kernel(x_ref, wkvq_t_ref, wlin_t_ref, w1_t_ref, b1_ref,
                           w2_t_ref, b2_ref, out_ref, att_ref,
                           *, heads, hidden_dim, bb, seq_len):
    """One grid step processes a block of `bb` batch elements entirely in VMEM."""
    C = hidden_dim
    T = seq_len
    dh = C // heads
    scale = 1.0 / (dh ** 0.5)

    x = x_ref[...]                              # (bb, T, C)
    xf = x.reshape(bb * T, C)                   # flatten: bigger MXU M dimension

    # linear_kvq (1x1 conv, no bias): (bb*T, C) @ (C, 3C) -- weight pre-transposed
    kvq = jnp.dot(xf, wkvq_t_ref[...], preferred_element_type=jnp.float32)

    # Gather per-head k/v/q into one head-major batch of size heads*bb so the
    # QK^T and PV matmuls each run as a SINGLE batched dot_general (instead of
    # `heads` separate matmuls).  Head-major order matches the PyTorch
    # (heads*B, T, T) attention layout, so no post-transpose is needed.
    k_parts, v_parts, q_parts = [], [], []
    for h in range(heads):                      # heads is small -> unrolled
        k_parts.append(kvq[:, h * dh:(h + 1) * dh].reshape(bb, T, dh))
        v_parts.append(kvq[:, C + h * dh:C + (h + 1) * dh].reshape(bb, T, dh))
        q_parts.append(kvq[:, 2 * C + h * dh:2 * C + (h + 1) * dh].reshape(bb, T, dh))
    k_all = jnp.concatenate(k_parts, axis=0)    # (heads*bb, T, dh), head-major
    v_all = jnp.concatenate(v_parts, axis=0)
    q_all = jnp.concatenate(q_parts, axis=0)

    # att[g, i, j] = <k_i, q_j> / sqrt(dh)   (i = key pos, j = query pos)
    att = lax.dot_general(k_all, q_all, (((2,), (2,)), ((0,), (0,))),
                          preferred_element_type=jnp.float32) * scale   # (hB,T,T)
    # softmax over the KEY axis (PyTorch dim=1).  Exact division: att is returned
    # to the user, so its rows must sum to exactly 1.
    att = jnp.exp(att - jnp.max(att, axis=1, keepdims=True))
    att = att / jnp.sum(att, axis=1, keepdims=True)

    # Lane-dense attention store: flatten (T, T) -> T*T lanes so the largest HBM
    # write of the kernel is unmasked (T=16 << 128 lanes in the naive layout).
    att_ref[...] = att.reshape(heads, bb, T * T)

    # out[g, j, d] = sum_i att[g, i, j] * v[g, i, d]
    oh = lax.dot_general(att, v_all, (((1,), (1,)), ((0,), (0,))),
                         preferred_element_type=jnp.float32)             # (hB,T,dh)

    # self.linear (1x1 conv, no bias) + residual, folded per head:
    #   concat_h(oh_h) @ Wlin^T == sum_h oh_h @ Wlin^T[h*dh:(h+1)*dh, :]
    # (sublane-aligned weight row slices; no scratch slab / masked column stores)
    wlin_t = wlin_t_ref[...]
    feature = xf
    for h in range(heads):
        oh_h = oh[h * bb:(h + 1) * bb].reshape(bb * T, dh)
        feature = feature + jnp.dot(oh_h, wlin_t[h * dh:(h + 1) * dh, :],
                                    preferred_element_type=jnp.float32)  # (bb*T,C)

    # PointwiseFeedForward: Conv1d(C,4C)+ReLU+Conv1d(4C,C), then ReLU(ff + feature)
    h1 = jnp.maximum(
        jnp.dot(feature, w1_t_ref[...], preferred_element_type=jnp.float32)
        + b1_ref[...], 0.0)                                               # (bb*T,4C)
    ff = jnp.dot(h1, w2_t_ref[...], preferred_element_type=jnp.float32) + b2_ref[...]
    out_ref[...] = jnp.maximum(ff + feature, 0.0).reshape(bb, T, C)


def attention_layer(x_nct, params, heads, *, num_batch_blocks=1):
    """x_nct: (B, C, T) float32 (PyTorch NCW). Returns (out (B,C,T), att (heads*B,T,T)).

    num_batch_blocks: grid steps over the batch.  Default 1 (single grid step) on
    all generations: per-step overhead (~0.35 us) dwarfs the compute at small
    sizes.  A >1 split is only honoured when it divides B and keeps the
    lane-dense att block legal (bb % 8 == 0); mark it "parallel" for multi-TC parts.
    """
    wkvq, wlin, w1, b1, w2, b2 = params
    B, C, T = x_nct.shape
    if num_batch_blocks > 1 and (B % num_batch_blocks != 0
                                 or (B // num_batch_blocks) % 8 != 0):
        num_batch_blocks = 1
    bb = B // num_batch_blocks

    x = jnp.transpose(x_nct, (0, 2, 1)).astype(jnp.float32)    # (B, T, C)

    # Pre-transpose weights once at trace time (outside the kernel).
    wkvq_t = jnp.transpose(wkvq).astype(jnp.float32)           # (C, 3C)
    wlin_t = jnp.transpose(wlin).astype(jnp.float32)           # (C, C)
    w1_t = jnp.transpose(w1).astype(jnp.float32)               # (C, 4C)
    w2_t = jnp.transpose(w2).astype(jnp.float32)               # (4C, C)
    b1_2d = b1.reshape(1, 4 * C).astype(jnp.float32)
    b2_2d = b2.reshape(1, C).astype(jnp.float32)

    kernel = functools.partial(attention_layer_kernel, heads=heads,
                               hidden_dim=C, bb=bb, seq_len=T)
    out, att = pl.pallas_call(
        kernel,
        out_shape=(jax.ShapeDtypeStruct((B, T, C), jnp.float32),
                   jax.ShapeDtypeStruct((heads, B, T * T), jnp.float32)),
        grid=(num_batch_blocks,),
        in_specs=[
            pl.BlockSpec((bb, T, C), lambda g: (g, 0, 0)),     # input batch block
            pl.BlockSpec((C, 3 * C), lambda g: (0, 0)),        # W_kvq^T
            pl.BlockSpec((C, C), lambda g: (0, 0)),            # W_linear^T
            pl.BlockSpec((C, 4 * C), lambda g: (0, 0)),        # W_ff1^T
            pl.BlockSpec((1, 4 * C), lambda g: (0, 0)),        # b_ff1
            pl.BlockSpec((4 * C, C), lambda g: (0, 0)),        # W_ff2^T
            pl.BlockSpec((1, C), lambda g: (0, 0)),            # b_ff2
        ],
        out_specs=(
            pl.BlockSpec((bb, T, C), lambda g: (g, 0, 0)),
            pl.BlockSpec((heads, bb, T * T), lambda g: (0, g, 0)),   # lane-dense att
        ),
        compiler_params=pltpu.CompilerParams(dimension_semantics=("parallel",)),
    )(x, wkvq_t, wlin_t, w1_t, b1_2d, w2_t, b2_2d)

    out_nct = jnp.transpose(out, (0, 2, 1))
    # (heads, B, T*T) -> (heads*B, T, T): element-order-preserving, free reshape.
    att_pt = att.reshape(heads * B, T, T)
    return out_nct, att_pt


def reference(x_nct, params, heads):
    """Plain-JAX reimplementation of the PyTorch forward, for verification."""
    wkvq, wlin, w1, b1, w2, b2 = params
    B, C, T = x_nct.shape
    dh = C // heads
    kvq = jnp.einsum('oc,bct->bot', wkvq, x_nct)               # (B, 3C, T)
    k, v, q = kvq[:, :C], kvq[:, C:2 * C], kvq[:, 2 * C:]

    def split_heads(t):  # (B, C, T) -> (heads*B, dh, T), head-major
        return jnp.concatenate([t[:, h * dh:(h + 1) * dh] for h in range(heads)], axis=0)

    k, v, q = split_heads(k), split_heads(v), split_heads(q)
    att = jnp.einsum('bdi,bdj->bij', k, q) / (dh ** 0.5)
    att = jax.nn.softmax(att, axis=1)
    xo = jnp.einsum('bdi,bij->bdj', v, att)                    # (heads*B, dh, T)
    xo = jnp.concatenate([xo[h * B:(h + 1) * B] for h in range(heads)], axis=1)  # (B,C,T)
    xo = jnp.einsum('oc,bct->bot', wlin, xo)
    feature = x_nct + xo
    h1 = jax.nn.relu(jnp.einsum('oc,bct->bot', w1, feature) + b1.reshape(1, -1, 1))
    ff = jnp.einsum('oc,bct->bot', w2, h1) + b2.reshape(1, -1, 1)
    return jax.nn.relu(ff + feature), att


if __name__ == "__main__":
    B, C, T, heads = 2, 32, 16, 4

    key = jax.random.PRNGKey(0)
    k0, k1, k2, k3, k4, k5, k6 = jax.random.split(key, 7)
    x = jax.random.normal(k0, (B, C, T), dtype=jnp.float32)

    params = (
        jax.random.normal(k1, (3 * C, C), dtype=jnp.float32) * 0.1,   # W_kvq
        jax.random.normal(k2, (C, C), dtype=jnp.float32) * 0.1,       # W_linear
        jax.random.normal(k3, (4 * C, C), dtype=jnp.float32) * 0.1,   # W_ff1
        jax.random.normal(k4, (4 * C,), dtype=jnp.float32) * 0.1,     # b_ff1
        jax.random.normal(k5, (C, 4 * C), dtype=jnp.float32) * 0.1,   # W_ff2
        jax.random.normal(k6, (C,), dtype=jnp.float32) * 0.1,         # b_ff2
    )

    out, att = attention_layer(x, params, heads)
    out = jax.block_until_ready(out)
    att = jax.block_until_ready(att)

    ref_out, ref_att = reference(x, params, heads)
    assert out.shape == (B, C, T)
    assert att.shape == (heads * B, T, T)
    assert jnp.allclose(out, ref_out, rtol=2e-3, atol=2e-3)
    assert jnp.allclose(att, ref_att, rtol=2e-3, atol=2e-3)

    print("KERNEL_OK")
</pallas_src>

<mosaic_0001>
module attributes {stable_mosaic.version = 11 : i64} {
  func.func @attention_layer_kernel(%arg0: i32, %arg1: memref<2x16x32xf32, #tpu.memory_space<vmem>>, %arg2: memref<32x96xf32, #tpu.memory_space<vmem>>, %arg3: memref<32x32xf32, #tpu.memory_space<vmem>>, %arg4: memref<32x128xf32, #tpu.memory_space<vmem>>, %arg5: memref<1x128xf32, #tpu.memory_space<vmem>>, %arg6: memref<128x32xf32, #tpu.memory_space<vmem>>, %arg7: memref<1x32xf32, #tpu.memory_space<vmem>>, %arg8: memref<2x16x32xf32, #tpu.memory_space<vmem>>, %arg9: memref<4x2x256xf32, #tpu.memory_space<vmem>>) attributes {dimension_semantics = [#tpu.dimension_semantics<parallel>], iteration_bounds = array<i64: 1>, scalar_prefetch = 0 : i64, scratch_operands = 0 : i64, tpu.core_type = #tpu.core_type<tc>, window_params = [{transform_indices = @transform_0, window_bounds = array<i64: 2, 16, 32>}, {pipeline_mode = #tpu.pipeline_mode<synchronous>, transform_indices = @transform_1, window_bounds = array<i64: 32, 96>}, {pipeline_mode = #tpu.pipeline_mode<synchronous>, transform_indices = @transform_2, window_bounds = array<i64: 32, 32>}, {pipeline_mode = #tpu.pipeline_mode<synchronous>, transform_indices = @transform_3, window_bounds = array<i64: 32, 128>}, {pipeline_mode = #tpu.pipeline_mode<synchronous>, transform_indices = @transform_4, window_bounds = array<i64: 1, 128>}, {pipeline_mode = #tpu.pipeline_mode<synchronous>, transform_indices = @transform_5, window_bounds = array<i64: 128, 32>}, {pipeline_mode = #tpu.pipeline_mode<synchronous>, transform_indices = @transform_6, window_bounds = array<i64: 1, 32>}, {transform_indices = @transform_7, window_bounds = array<i64: 2, 16, 32>}, {transform_indices = @transform_8, window_bounds = array<i64: 4, 2, 256>}]} {
    %c0 = arith.constant 0 : index
    %c0_0 = arith.constant 0 : index
    %c0_1 = arith.constant 0 : index
    %0 = vector.load %arg1[%c0, %c0_0, %c0_1] : memref<2x16x32xf32, #tpu.memory_space<vmem>>, vector<2x16x32xf32>
    %1 = vector.shape_cast %0 : vector<2x16x32xf32> to vector<32x32xf32>
    %c0_2 = arith.constant 0 : index
    %c0_3 = arith.constant 0 : index
    %2 = vector.load %arg2[%c0_2, %c0_3] : memref<32x96xf32, #tpu.memory_space<vmem>>, vector<32x96xf32>
    %cst = arith.constant dense<0.000000e+00> : vector<32x96xf32>
    %3 = tpu.matmul %1, %2, %cst {dimension_numbers = #tpu.dot_dimension_numbers<[1], [0], [0], [1], [0, 0, 1, 1], [], []>} : vector<32x32xf32>, vector<32x96xf32>, vector<32x96xf32> -> vector<32x96xf32>
    %4 = vector.extract_strided_slice %3 {offsets = [0, 0], sizes = [32, 8], strides = [1, 1]} : vector<32x96xf32> to vector<32x8xf32>
    %5 = vector.shape_cast %4 : vector<32x8xf32> to vector<2x16x8xf32>
    %6 = vector.extract_strided_slice %3 {offsets = [0, 32], sizes = [32, 8], strides = [1, 1]} : vector<32x96xf32> to vector<32x8xf32>
    %7 = vector.shape_cast %6 : vector<32x8xf32> to vector<2x16x8xf32>
    %8 = vector.extract_strided_slice %3 {offsets = [0, 64], sizes = [32, 8], strides = [1, 1]} : vector<32x96xf32> to vector<32x8xf32>
    %9 = vector.shape_cast %8 : vector<32x8xf32> to vector<2x16x8xf32>
    %10 = vector.extract_strided_slice %3 {offsets = [0, 8], sizes = [32, 8], strides = [1, 1]} : vector<32x96xf32> to vector<32x8xf32>
    %11 = vector.shape_cast %10 : vector<32x8xf32> to vector<2x16x8xf32>
    %12 = vector.extract_strided_slice %3 {offsets = [0, 40], sizes = [32, 8], strides = [1, 1]} : vector<32x96xf32> to vector<32x8xf32>
    %13 = vector.shape_cast %12 : vector<32x8xf32> to vector<2x16x8xf32>
    %14 = vector.extract_strided_slice %3 {offsets = [0, 72], sizes = [32, 8], strides = [1, 1]} : vector<32x96xf32> to vector<32x8xf32>
    %15 = vector.shape_cast %14 : vector<32x8xf32> to vector<2x16x8xf32>
    %16 = vector.extract_strided_slice %3 {offsets = [0, 16], sizes = [32, 8], strides = [1, 1]} : vector<32x96xf32> to vector<32x8xf32>
    %17 = vector.shape_cast %16 : vector<32x8xf32> to vector<2x16x8xf32>
    %18 = vector.extract_strided_slice %3 {offsets = [0, 48], sizes = [32, 8], strides = [1, 1]} : vector<32x96xf32> to vector<32x8xf32>
    %19 = vector.shape_cast %18 : vector<32x8xf32> to vector<2x16x8xf32>
    %20 = vector.extract_strided_slice %3 {offsets = [0, 80], sizes = [32, 8], strides = [1, 1]} : vector<32x96xf32> to vector<32x8xf32>
    %21 = vector.shape_cast %20 : vector<32x8xf32> to vector<2x16x8xf32>
    %22 = vector.extract_strided_slice %3 {offsets = [0, 24], sizes = [32, 8], strides = [1, 1]} : vector<32x96xf32> to vector<32x8xf32>
    %23 = vector.shape_cast %22 : vector<32x8xf32> to vector<2x16x8xf32>
    %24 = vector.extract_strided_slice %3 {offsets = [0, 56], sizes = [32, 8], strides = [1, 1]} : vector<32x96xf32> to vector<32x8xf32>
    %25 = vector.shape_cast %24 : vector<32x8xf32> to vector<2x16x8xf32>
    %26 = vector.extract_strided_slice %3 {offsets = [0, 88], sizes = [32, 8], strides = [1, 1]} : vector<32x96xf32> to vector<32x8xf32>
    %27 = vector.shape_cast %26 : vector<32x8xf32> to vector<2x16x8xf32>
    %28 = tpu.concatenate %5, %11, %17, %23 in 0 : vector<2x16x8xf32>, vector<2x16x8xf32>, vector<2x16x8xf32>, vector<2x16x8xf32> -> vector<8x16x8xf32>
    %29 = tpu.concatenate %7, %13, %19, %25 in 0 : vector<2x16x8xf32>, vector<2x16x8xf32>, vector<2x16x8xf32>, vector<2x16x8xf32> -> vector<8x16x8xf32>
    %30 = tpu.concatenate %9, %15, %21, %27 in 0 : vector<2x16x8xf32>, vector<2x16x8xf32>, vector<2x16x8xf32>, vector<2x16x8xf32> -> vector<8x16x8xf32>
    %cst_4 = arith.constant dense<0.000000e+00> : vector<8x16x16xf32>
    %31 = tpu.matmul %28, %30, %cst_4 {dimension_numbers = #tpu.dot_dimension_numbers<[2], [2], [1], [1], [0, 0, 0, 1, 1, 1], [0], [0]>} : vector<8x16x8xf32>, vector<8x16x8xf32>, vector<8x16x16xf32> -> vector<8x16x16xf32>
    %cst_5 = arith.constant 0.353553385 : f32
    %32 = vector.broadcast %cst_5 : f32 to vector<8x16x16xf32>
    %33 = arith.mulf %31, %32 : vector<8x16x16xf32>
    %cst_6 = arith.constant dense<0xFF800000> : vector<8x16xf32>
    %34 = vector.multi_reduction <maximumf>, %33, %cst_6 [1] : vector<8x16x16xf32> to vector<8x16xf32>
    %35 = vector.shape_cast %34 : vector<8x16xf32> to vector<8x1x16xf32>
    %36 = vector.broadcast %35 : vector<8x1x16xf32> to vector<8x16x16xf32>
    %37 = arith.subf %33, %36 : vector<8x16x16xf32>
    %38 = math.exp %37 : vector<8x16x16xf32>
    %cst_7 = arith.constant dense<0.000000e+00> : vector<8x16xf32>
    %39 = vector.multi_reduction <add>, %38, %cst_7 [1] : vector<8x16x16xf32> to vector<8x16xf32>
    %40 = vector.shape_cast %39 : vector<8x16xf32> to vector<8x1x16xf32>
    %41 = vector.broadcast %40 : vector<8x1x16xf32> to vector<8x16x16xf32>
    %42 = arith.divf %38, %41 : vector<8x16x16xf32>
    %43 = vector.shape_cast %42 : vector<8x16x16xf32> to vector<4x2x256xf32>
    %c0_8 = arith.constant 0 : index
    %c0_9 = arith.constant 0 : index
    %c0_10 = arith.constant 0 : index
    %44 = vector.load %arg9[%c0_8, %c0_9, %c0_10] : memref<4x2x256xf32, #tpu.memory_space<vmem>>, vector<4x2x256xf32>
    tpu.vector_store %arg9[%c0_8, %c0_9, %c0_10], %43 {strides = array<i32>} : memref<4x2x256xf32, #tpu.memory_space<vmem>>, vector<4x2x256xf32>,
    %cst_11 = arith.constant dense<0.000000e+00> : vector<8x16x8xf32>
    %45 = tpu.matmul %42, %29, %cst_11 {dimension_numbers = #tpu.dot_dimension_numbers<[1], [1], [2], [2], [0, 0, 0, 2, 1, 2], [0], [0]>} : vector<8x16x16xf32>, vector<8x16x8xf32>, vector<8x16x8xf32> -> vector<8x16x8xf32>
    %c0_12 = arith.constant 0 : index
    %c0_13 = arith.constant 0 : index
    %46 = vector.load %arg3[%c0_12, %c0_13] : memref<32x32xf32, #tpu.memory_space<vmem>>, vector<32x32xf32>
    %47 = vector.extract_strided_slice %45 {offsets = [0, 0, 0], sizes = [2, 16, 8], strides = [1, 1, 1]} : vector<8x16x8xf32> to vector<2x16x8xf32>
    %48 = vector.shape_cast %47 : vector<2x16x8xf32> to vector<32x8xf32>
    %49 = vector.extract_strided_slice %46 {offsets = [0, 0], sizes = [8, 32], strides = [1, 1]} : vector<32x32xf32> to vector<8x32xf32>
    %cst_14 = arith.constant dense<0.000000e+00> : vector<32x32xf32>
    %50 = tpu.matmul %48, %49, %cst_14 {dimension_numbers = #tpu.dot_dimension_numbers<[1], [0], [0], [1], [0, 0, 1, 1], [], []>} : vector<32x8xf32>, vector<8x32xf32>, vector<32x32xf32> -> vector<32x32xf32>
    %51 = arith.addf %1, %50 : vector<32x32xf32>
    %52 = vector.extract_strided_slice %45 {offsets = [2, 0, 0], sizes = [2, 16, 8], strides = [1, 1, 1]} : vector<8x16x8xf32> to vector<2x16x8xf32>
    %53 = vector.shape_cast %52 : vector<2x16x8xf32> to vector<32x8xf32>
    %54 = vector.extract_strided_slice %46 {offsets = [8, 0], sizes = [8, 32], strides = [1, 1]} : vector<32x32xf32> to vector<8x32xf32>
    %cst_15 = arith.constant dense<0.000000e+00> : vector<32x32xf32>
    %55 = tpu.matmul %53, %54, %cst_15 {dimension_numbers = #tpu.dot_dimension_numbers<[1], [0], [0], [1], [0, 0, 1, 1], [], []>} : vector<32x8xf32>, vector<8x32xf32>, vector<32x32xf32> -> vector<32x32xf32>
    %56 = arith.addf %51, %55 : vector<32x32xf32>
    %57 = vector.extract_strided_slice %45 {offsets = [4, 0, 0], sizes = [2, 16, 8], strides = [1, 1, 1]} : vector<8x16x8xf32> to vector<2x16x8xf32>
    %58 = vector.shape_cast %57 : vector<2x16x8xf32> to vector<32x8xf32>
    %59 = vector.extract_strided_slice %46 {offsets = [16, 0], sizes = [8, 32], strides = [1, 1]} : vector<32x32xf32> to vector<8x32xf32>
    %cst_16 = arith.constant dense<0.000000e+00> : vector<32x32xf32>
    %60 = tpu.matmul %58, %59, %cst_16 {dimension_numbers = #tpu.dot_dimension_numbers<[1], [0], [0], [1], [0, 0, 1, 1], [], []>} : vector<32x8xf32>, vector<8x32xf32>, vector<32x32xf32> -> vector<32x32xf32>
    %61 = arith.addf %56, %60 : vector<32x32xf32>
    %62 = vector.extract_strided_slice %45 {offsets = [6, 0, 0], sizes = [2, 16, 8], strides = [1, 1, 1]} : vector<8x16x8xf32> to vector<2x16x8xf32>
    %63 = vector.shape_cast %62 : vector<2x16x8xf32> to vector<32x8xf32>
    %64 = vector.extract_strided_slice %46 {offsets = [24, 0], sizes = [8, 32], strides = [1, 1]} : vector<32x32xf32> to vector<8x32xf32>
    %cst_17 = arith.constant dense<0.000000e+00> : vector<32x32xf32>
    %65 = tpu.matmul %63, %64, %cst_17 {dimension_numbers = #tpu.dot_dimension_numbers<[1], [0], [0], [1], [0, 0, 1, 1], [], []>} : vector<32x8xf32>, vector<8x32xf32>, vector<32x32xf32> -> vector<32x32xf32>
    %66 = arith.addf %61, %65 : vector<32x32xf32>
    %c0_18 = arith.constant 0 : index
    %c0_19 = arith.constant 0 : index
    %67 = vector.load %arg4[%c0_18, %c0_19] : memref<32x128xf32, #tpu.memory_space<vmem>>, vector<32x128xf32>
    %cst_20 = arith.constant dense<0.000000e+00> : vector<32x128xf32>
    %68 = tpu.matmul %66, %67, %cst_20 {dimension_numbers = #tpu.dot_dimension_numbers<[1], [0], [0], [1], [0, 0, 1, 1], [], []>} : vector<32x32xf32>, vector<32x128xf32>, vector<32x128xf32> -> vector<32x128xf32>
    %c0_21 = arith.constant 0 : index
    %c0_22 = arith.constant 0 : index
    %69 = vector.load %arg5[%c0_21, %c0_22] : memref<1x128xf32, #tpu.memory_space<vmem>>, vector<1x128xf32>
    %70 = vector.broadcast %69 : vector<1x128xf32> to vector<32x128xf32>
    %71 = arith.addf %68, %70 : vector<32x128xf32>
    %cst_23 = arith.constant 0.000000e+00 : f32
    %72 = vector.broadcast %cst_23 : f32 to vector<32x128xf32>
    %73 = arith.maximumf %71, %72 : vector<32x128xf32>
    %c0_24 = arith.constant 0 : index
    %c0_25 = arith.constant 0 : index
    %74 = vector.load %arg6[%c0_24, %c0_25] : memref<128x32xf32, #tpu.memory_space<vmem>>, vector<128x32xf32>
    %cst_26 = arith.constant dense<0.000000e+00> : vector<32x32xf32>
    %75 = tpu.matmul %73, %74, %cst_26 {dimension_numbers = #tpu.dot_dimension_numbers<[1], [0], [0], [1], [0, 0, 1, 1], [], []>} : vector<32x128xf32>, vector<128x32xf32>, vector<32x32xf32> -> vector<32x32xf32>
    %c0_27 = arith.constant 0 : index
    %c0_28 = arith.constant 0 : index
    %76 = vector.load %arg7[%c0_27, %c0_28] : memref<1x32xf32, #tpu.memory_space<vmem>>, vector<1x32xf32>
    %77 = vector.broadcast %76 : vector<1x32xf32> to vector<32x32xf32>
    %78 = arith.addf %75, %77 : vector<32x32xf32>
    %79 = arith.addf %78, %66 : vector<32x32xf32>
    %cst_29 = arith.constant 0.000000e+00 : f32
    %80 = vector.broadcast %cst_29 : f32 to vector<32x32xf32>
    %81 = arith.maximumf %79, %80 : vector<32x32xf32>
    %82 = vector.shape_cast %81 : vector<32x32xf32> to vector<2x16x32xf32>
    %c0_30 = arith.constant 0 : index
    %c0_31 = arith.constant 0 : index
    %c0_32 = arith.constant 0 : index
    %83 = vector.load %arg8[%c0_30, %c0_31, %c0_32] : memref<2x16x32xf32, #tpu.memory_space<vmem>>, vector<2x16x32xf32>
    tpu.vector_store %arg8[%c0_30, %c0_31, %c0_32], %82 {strides = array<i32>} : memref<2x16x32xf32, #tpu.memory_space<vmem>>, vector<2x16x32xf32>,
    return
  }
  func.func @transform_0(%arg0: i32) -> (i32, i32, i32) {
    %c0_i32 = arith.constant 0 : i32
    %c0_i32_0 = arith.constant 0 : i32
    %c0_i32_1 = arith.constant 0 : i32
    return %arg0, %c0_i32, %c0_i32_0 : i32, i32, i32
  }
  func.func @transform_1(%arg0: i32) -> (i32, i32) {
    %c0_i32 = arith.constant 0 : i32
    %c0_i32_0 = arith.constant 0 : i32
    %c0_i32_1 = arith.constant 0 : i32
    return %c0_i32, %c0_i32_0 : i32, i32
  }
  func.func @transform_2(%arg0: i32) -> (i32, i32) {
    %c0_i32 = arith.constant 0 : i32
    %c0_i32_0 = arith.constant 0 : i32
    %c0_i32_1 = arith.constant 0 : i32
    return %c0_i32, %c0_i32_0 : i32, i32
  }
  func.func @transform_3(%arg0: i32) -> (i32, i32) {
    %c0_i32 = arith.constant 0 : i32
    %c0_i32_0 = arith.constant 0 : i32
    %c0_i32_1 = arith.constant 0 : i32
    return %c0_i32, %c0_i32_0 : i32, i32
  }
  func.func @transform_4(%arg0: i32) -> (i32, i32) {
    %c0_i32 = arith.constant 0 : i32
    %c0_i32_0 = arith.constant 0 : i32
    %c0_i32_1 = arith.constant 0 : i32
    return %c0_i32, %c0_i32_0 : i32, i32
  }
  func.func @transform_5(%arg0: i32) -> (i32, i32) {
    %c0_i32 = arith.constant 0 : i32
    %c0_i32_0 = arith.constant 0 : i32
    %c0_i32_1 = arith.constant 0 : i32
    return %c0_i32, %c0_i32_0 : i32, i32
  }
  func.func @transform_6(%arg0: i32) -> (i32, i32) {
    %c0_i32 = arith.constant 0 : i32
    %c0_i32_0 = arith.constant 0 : i32
    %c0_i32_1 = arith.constant 0 : i32
    return %c0_i32, %c0_i32_0 : i32, i32
  }
  func.func @transform_7(%arg0: i32) -> (i32, i32, i32) {
    %c0_i32 = arith.constant 0 : i32
    %c0_i32_0 = arith.constant 0 : i32
    %c0_i32_1 = arith.constant 0 : i32
    return %arg0, %c0_i32, %c0_i32_0 : i32, i32, i32
  }
  func.func @transform_8(%arg0: i32) -> (i32, i32, i32) {
    %c0_i32 = arith.constant 0 : i32
    %c0_i32_0 = arith.constant 0 : i32
    %c0_i32_1 = arith.constant 0 : i32
    return %c0_i32, %arg0, %c0_i32_0 : i32, i32, i32
  }
}

</mosaic_0001>

<bundles_post_ra>
// kernel: tpu_custom_call.1
= control target key start
LH: loop header
LB: loop body
LE: loop exit
PB: predicated region body
PF: predicated region fallthrough
CT: control target
= control target key end

     0   :  { %14 = vsyncpa [#allocation3], 0  ;;  %vm38_vm0 = vcmask 261120   ;;  %s5364_s0 = inlined_call_operand.vmem [shape: f32[2,16,32], index: 0, kind: input, shape index: {}]   ;;  %s5365_s1 = inlined_call_operand.vmem [shape: f32[32,96], index: 1, kind: input, shape index: {}]   ;;  %s5366_s2 = inlined_call_operand.vmem [shape: f32[32,32], index: 2, kind: input, shape index: {}]   ;;  %s5367_s3 = inlined_call_operand.vmem [shape: f32[32,128], index: 3, kind: input, shape index: {}]   ;;  %s5368_s4 = inlined_call_operand.vmem [shape: f32[1,128], index: 4, kind: input, shape index: {}]   ;;  %s5369_s5 = inlined_call_operand.vmem [shape: f32[128,32], index: 5, kind: input, shape index: {}]   ;;  %s5370_s6 = inlined_call_operand.vmem [shape: f32[1,32], index: 6, kind: input, shape index: {}]   ;;  %s5371_s7 = inlined_call_operand.hbm [shape: f32[2,16,32], index: 7, kind: output, shape index: {0}]   ;;  %s5372_s8 = inlined_call_operand.hbm [shape: f32[4,2,256], index: 8, kind: output, shape index: {1}]  }
   0x1   :  { %v34_v0 = vld [vmem:[%s5365_s1] sm:$0xff]  ;;  %v35_v1 = vld [vmem:[%s5365_s1 + $0x8] sm:$0xff]  ;;  %v36_v2 = vld [vmem:[%s5365_s1 + $0x10] sm:$0xff] }
   0x2   :  { %v3987_v3 = vpack.c.bf16 %v35_v1, %v34_v0  ;;  %v37_v4 = vld [vmem:[%s5365_s1 + $0x18] sm:$0xff]  ;;  %v30_v5 = vld [vmem:[%s5364_s0] sm:$0xff] }
   0x3   :  { %v3991_v6 = vpack.c.bf16 %v37_v4, %v36_v2  ;;  %3785 = vmatprep.mubr.msk.f32.mxu0 %vm38_vm0, %v30_v5 }
   0x4   :  { %15 = vsyncpa [#allocation5], 0  ;;  %3988 = vmatprep.subr.bf16.mxu0 %v3987_v3  ;;  %v31_v7 = vld [vmem:[%s5364_s0 + $0x8] sm:$0xff]  ;;  %v32_v8 = vld [vmem:[%s5364_s0 + $0x10] sm:$0xff]  ;;  %vm168_vm1 = vcmask 64512   ;;  %s4328_s20 = smov 120  }
   0x5   :  { %3990 = vmatpush3.bf16.msra.mxu0 %v3987_v3  ;;  %v33_v9 = vld [vmem:[%s5364_s0 + $0x18] sm:$0xff]  ;;  %s4329_s21 = smov 112   ;;  %s4330_s22 = smov 104   ;;  %vm4477_vm2 = vmpackc.low %vm168_vm1, %vm168_vm1  ;;  %vm877_vm3 = vcmask 130048   ;;  %vm1854_vm4 = vcmask 392192   ;;  %vm1859_vm5 = vcmask 523264  }
   0x6   :  { %3992 = vmatprep.subr.bf16.mxu0 %v3991_v6  ;;  %s4331_s23 = smov 64   ;;  %s4332_s24 = smov 96   ;;  %vm1864_vm6 = vcmask 654336   ;;  %vm1869_vm7 = vcmask 785408   ;;  %vm1874_vm8 = vcmask 916480  }
   0x7   :  { %s4336_s25 = smov 16   ;;  %s4337_s26 = smov 32  }
   0x8   :  { %s4338_s27 = smov 48   ;;  %s4339_s28 = smov 80  }
   0x9   :  { %3994 = vmatpush3.bf16.msra.mxu0 %v3991_v6 }
   0xc   :  { %3786 = vmatmul.mubr.msk.f32.vlgmr.msra.gmra.mrb[0].mxu0 %vm38_vm0, %v31_v7 }
   0xd   :  { %3788 = vmatprep.mubr.msk.f32.mxu0 %vm38_vm0, %v32_v8 }
  0x10   :  { %3789 = vmatmul.mubr.msk.f32.gmra.mrb[2].mxu0 %vm38_vm0, %v33_v9 }
  0xdf   :  { %v4418_v10 = vpop.f32.mrb[0].mxu0 }
  0xe0   :  { %v117_v11 = vpop.f32.mrb[1].mxu0 }
  0xe1   :  { %140 = vrot.lane.b32.xlu0 %v117_v11, %s4328_s20  ;;  %3795 = vmatprep.mubr.msk.f32.mxu0 %vm168_vm1, %v117_v11  ;;  %v4148_v12 = vpack.i.bf16 %v4418_v10, %v117_v11 }
  0xe3   :  { %v4422_v13 = vpop.f32.mrb[2].mxu0 }
  0xe4   :  { %146 = vrot.lane.b32.xlu1 %v4422_v13, %s4328_s20  ;;  %v127_v14 = vpop.f32.mrb[3].mxu0 }
  0xe5   :  { %142 = vrot.lane.b32.xlu0 %v4418_v10, %s4328_s20  ;;  %v4153_v15 = vpack.i.bf16 %v4422_v13, %v127_v14 }
  0xe8   :  { %144 = vrot.lane.b32.xlu1 %v127_v14, %s4328_s20 }
  0xe9   :  { %148 = vrot.lane.b32.xlu0 %v117_v11, %s4329_s21 }
  0xec   :  { %150 = vrot.lane.b32.xlu1 %v4418_v10, %s4329_s21 }
  0xed   :  { %152 = vrot.lane.b32.xlu0 %v127_v14, %s4329_s21 }
  0xf0   :  { %154 = vrot.lane.b32.xlu1 %v4422_v13, %s4329_s21 }
  0xf1   :  { %156 = vrot.lane.b32.xlu0 %v117_v11, %s4330_s22 }
  0xf4   :  { %158 = vrot.lane.b32.xlu1 %v4418_v10, %s4330_s22 }
  0xf5   :  { %160 = vrot.lane.b32.xlu0 %v127_v14, %s4330_s22 }
  0xf8   :  { %162 = vrot.lane.b32.xlu1 %v4422_v13, %s4330_s22 }
  0xf9   :  { %4149 = vrot.lane.b32.xlu0 %v4148_v12, %s4331_s23 }
  0xfc   :  { %4154 = vrot.lane.b32.xlu1 %v4153_v15, %s4331_s23 }
 0x153   :  { %v141_v16 = vpop.permute.xlu0 %140 }
 0x154   :  { %3809 = vmatprep.mubr.msk.f32.mxu1 %vm168_vm1, %v141_v16 }
 0x156   :  { %v4438_v17 = vpop.permute.xlu1 %146 }
 0x157   :  { %v4440_v18 = vpop.permute.xlu0 %142 }
 0x158   :  { %v4158_v19 = vpack.i.bf16 %v4440_v18, %v141_v16 }
 0x15a   :  { %4159 = vrot.lane.b32.xlu0 %v4158_v19, %s4331_s23  ;;  %v145_v20 = vpop.permute.xlu1 %144 }
 0x15b   :  { %v4163_v21 = vpack.i.bf16 %v4438_v17, %v145_v20  ;;  %v4445_v22 = vpop.permute.xlu0 %148 }
 0x15d   :  { %4164 = vrot.lane.b32.xlu1 %v4163_v21, %s4331_s23 }
 0x15e   :  { %v4448_v23 = vpop.permute.xlu1 %150 }
 0x15f   :  { %v4168_v24 = vpack.i.bf16 %v4448_v23, %v4445_v22  ;;  %v4452_v25 = vpop.permute.xlu0 %152 }
 0x161   :  { %4169 = vrot.lane.b32.xlu0 %v4168_v24, %s4331_s23 }
 0x162   :  { %v4455_v26 = vpop.permute.xlu1 %154 }
 0x163   :  { %v4173_v27 = vpack.i.bf16 %v4455_v26, %v4452_v25  ;;  %v4459_v28 = vpop.permute.xlu0 %156 }
 0x165   :  { %4174 = vrot.lane.b32.xlu1 %v4173_v27, %s4331_s23 }
 0x166   :  { %v4462_v29 = vpop.permute.xlu1 %158 }
 0x167   :  { %v4178_v30 = vpack.i.bf16 %v4462_v29, %v4459_v28  ;;  %v4466_v31 = vpop.permute.xlu0 %160 }
 0x169   :  { %4179 = vrot.lane.b32.xlu0 %v4178_v30, %s4331_s23 }
 0x16a   :  { %v4469_v32 = vpop.permute.xlu1 %162 }
 0x16b   :  { %v4183_v33 = vpack.i.bf16 %v4469_v32, %v4466_v31  ;;  %v4150_v34 = vpop.permute.xlu0 %4149 }
 0x16c   :  { %v4152_v35 = vunpack.i.h.bf16 %v4150_v34  ;;  %v4151_v36 = vunpack.i.l.bf16 %v4150_v34 }
 0x16d   :  { %4189 = vrot.lane.b32.xlu0 %v4148_v12, %s4332_s24  ;;  %4184 = vrot.lane.b32.xlu1 %v4183_v33, %s4331_s23 }
 0x16e   :  { %v3995_v38 = vpack.c.bf16 %v4152_v35, %v4151_v36  ;;  %v4155_v39 = vpop.permute.xlu1 %4154 }
 0x16f   :  { %v4157_v40 = vunpack.i.h.bf16 %v4155_v39  ;;  %v4156_v41 = vunpack.i.l.bf16 %v4155_v39 }
 0x170   :  { %3997 = vmatprep.subr.msk.bf16.mxu0 %vm4477_vm2, %v3995_v38 }
 0x171   :  { %v4001_v42 = vpack.c.bf16 %v4157_v40, %v4156_v41  ;;  %4000 = vmatpush3.bf16.xpose.msk.msra.mxu0 %vm4477_vm2, %v3995_v38  ;;  %4199 = vrot.lane.b32.xlu0 %v4158_v19, %s4332_s24 }
 0x172   :  { %4194 = vrot.lane.b32.xlu1 %v4153_v15, %s4332_s24 }
 0x173   :  { %4003 = vmatprep.subr.msk.bf16.mxu0 %vm4477_vm2, %v4001_v42 }
 0x175   :  { %4204 = vrot.lane.b32.xlu0 %v4168_v24, %s4332_s24 }
 0x176   :  { %4214 = vrot.lane.b32.xlu1 %v4163_v21, %s4332_s24 }
 0x178   :  { %3796 = vmatmul.mubr.msk.f32.vlgmr.msra.gmra.mrb[4].mxu0 %vm168_vm1, %v4418_v10 }
 0x179   :  { %3802 = vmatprep.mubr.msk.f32.mxu0 %vm168_vm1, %v127_v14  ;;  %4209 = vrot.lane.b32.xlu0 %v4178_v30, %s4332_s24 }
 0x17a   :  { %4219 = vrot.lane.b32.xlu1 %v4173_v27, %s4332_s24  ;;  %4006 = vmatpush3.bf16.xpose.msk.msra.mxu0 %vm4477_vm2, %v4001_v42 }
 0x17d   :  { %4224 = vrot.lane.b32.xlu0 %v4183_v33, %s4332_s24 }
 0x181   :  { %3803 = vmatmul.mubr.msk.f32.vlgmr.msra.gmra.mrb[6].mxu0 %vm168_vm1, %v4422_v13 }
 0x182   :  { %3816 = vmatprep.mubr.msk.f32.mxu0 %vm168_vm1, %v145_v20 }
 0x1cc   :  { %v4160_v43 = vpop.permute.xlu0 %4159 }
 0x1cd   :  { %v4162_v44 = vunpack.i.h.bf16 %v4160_v43  ;;  %v4161_v45 = vunpack.i.l.bf16 %v4160_v43 }
 0x1cf   :  { %v4165_v46 = vpop.permute.xlu1 %4164  ;;  %v4007_v47 = vpack.c.bf16 %v4162_v44, %v4161_v45 }
 0x1d0   :  { %v4167_v48 = vunpack.i.h.bf16 %v4165_v46  ;;  %v4166_v49 = vunpack.i.l.bf16 %v4165_v46 }
 0x1d1   :  { %4009 = vmatprep.subr.msk.bf16.mxu1 %vm4477_vm2, %v4007_v47 }
 0x1d2   :  { %v4013_v50 = vpack.c.bf16 %v4167_v48, %v4166_v49  ;;  %4012 = vmatpush3.bf16.xpose.msk.msra.mxu1 %vm4477_vm2, %v4007_v47 }
 0x1d3   :  { %v4170_v51 = vpop.permute.xlu0 %4169 }
 0x1d4   :  { %v4172_v52 = vunpack.i.h.bf16 %v4170_v51  ;;  %v4171_v53 = vunpack.i.l.bf16 %v4170_v51  ;;  %4015 = vmatprep.subr.msk.bf16.mxu0 %vm4477_vm2, %v4013_v50 }
 0x1d5   :  { %4018 = vmatpush3.bf16.xpose.msk.msra.mxu0 %vm4477_vm2, %v4013_v50 }
 0x1d6   :  { %v4019_v54 = vpack.c.bf16 %v4172_v52, %v4171_v53 }
 0x1d7   :  { %v4175_v55 = vpop.permute.xlu1 %4174 }
 0x1d8   :  { %v4177_v56 = vunpack.i.h.bf16 %v4175_v55  ;;  %v4176_v57 = vunpack.i.l.bf16 %v4175_v55  ;;  %4021 = vmatprep.subr.msk.bf16.mxu1 %vm4477_vm2, %v4019_v54 }
 0x1d9   :  { %3810 = vmatmul.mubr.msk.f32.vlgmr.msra.gmra.mrb[0].mxu1 %vm168_vm1, %v4440_v18 }
 0x1da   :  { %v4025_v58 = vpack.c.bf16 %v4177_v56, %v4176_v57  ;;  %4024 = vmatpush3.bf16.xpose.msk.msra.mxu1 %vm4477_vm2, %v4019_v54  ;;  %3823 = vmatprep.mubr.msk.f32.mxu1 %vm168_vm1, %v4445_v22 }
 0x1db   :  { %v4180_v59 = vpop.permute.xlu0 %4179 }
 0x1dc   :  { %v4182_v60 = vunpack.i.h.bf16 %v4180_v59  ;;  %v4181_v61 = vunpack.i.l.bf16 %v4180_v59  ;;  %3817 = vmatmul.mubr.msk.f32.vlgmr.msra.gmra.mrb[8].mxu0 %vm168_vm1, %v4438_v17  ;;  %4027 = vmatprep.subr.msk.bf16.mxu0 %vm4477_vm2, %v4025_v58 }
 0x1dd   :  { %4030 = vmatpush3.bf16.xpose.msk.msra.mxu0 %vm4477_vm2, %v4025_v58  ;;  %3830 = vmatprep.mubr.msk.f32.mxu0 %vm168_vm1, %v4452_v25 }
 0x1de   :  { %v4031_v62 = vpack.c.bf16 %v4182_v60, %v4181_v61 }
 0x1df   :  { %v4190_v63 = vpop.permute.xlu0 %4189  ;;  %v4185_v0 = vpop.permute.xlu1 %4184 }
 0x1e0   :  { %v4192_v1 = vunpack.i.h.bf16 %v4190_v63  ;;  %v4191_v2 = vunpack.i.l.bf16 %v4190_v63  ;;  %v4187_v3 = vunpack.i.h.bf16 %v4185_v0  ;;  %v4186_v4 = vunpack.i.l.bf16 %v4185_v0  ;;  %4033 = vmatprep.subr.msk.bf16.mxu1 %vm4477_vm2, %v4031_v62 }
 0x1e1   :  { %3824 = vmatmul.mubr.msk.f32.vlgmr.msra.gmra.mrb[2].mxu1 %vm168_vm1, %v4448_v23 }
 0x1e2   :  { %v4043_v5 = vpack.c.bf16 %v4192_v1, %v4191_v2  ;;  %v4037_v6 = vpack.c.bf16 %v4187_v3, %v4186_v4  ;;  %4036 = vmatpush3.bf16.xpose.msk.msra.mxu1 %vm4477_vm2, %v4031_v62  ;;  %3837 = vmatprep.mubr.msk.f32.mxu1 %vm168_vm1, %v4459_v28 }
 0x1e3   :  { %v4200_v7 = vpop.permute.xlu0 %4199 }
 0x1e4   :  { %v4202_v8 = vunpack.i.h.bf16 %v4200_v7  ;;  %v4201_v9 = vunpack.i.l.bf16 %v4200_v7  ;;  %v4195_v10 = vpop.permute.xlu1 %4194  ;;  %3831 = vmatmul.mubr.msk.f32.vlgmr.msra.gmra.mrb[10].mxu0 %vm168_vm1, %v4455_v26  ;;  %4039 = vmatprep.subr.msk.bf16.mxu0 %vm4477_vm2, %v4037_v6 }
 0x1e5   :  { %v4197_v11 = vunpack.i.h.bf16 %v4195_v10  ;;  %v4196_v12 = vunpack.i.l.bf16 %v4195_v10  ;;  %4044 = vmatprep.subr.bf16.mxu1 %v4043_v5  ;;  %4042 = vmatpush3.bf16.xpose.msk.msra.mxu0 %vm4477_vm2, %v4037_v6 }
 0x1e6   :  { %v4051_v13 = vpack.c.bf16 %v4202_v8, %v4201_v9  ;;  %3844 = vmatprep.mubr.msk.f32.mxu0 %vm168_vm1, %v4466_v31 }
 0x1e7   :  { %v4205_v14 = vpop.permute.xlu0 %4204  ;;  %v4542_v17 = vpack.c.bf16 %v4197_v11, %v4196_v12  ;;  %v4333_v11 = vmov 1983009808  }
 0x1e8   :  { %v4207_v15 = vunpack.i.h.bf16 %v4205_v14  ;;  %v4206_v16 = vunpack.i.l.bf16 %v4205_v14  ;;  %4052 = vmatprep.subr.bf16.mxu0 %v4051_v13  ;;  %v1096_v12 = vunpack.c.l.s4 %v4333_v11 }
 0x1e9   :  { %3838 = vmatmul.mubr.msk.f32.vlgmr.msra.gmra.mrb[4].mxu1 %vm168_vm1, %v4462_v29 }
 0x1ea   :  { %4046 = vmatpush3.bf16.msra.mxu1 %v4043_v5  ;;  %v4547_v18 = vpack.c.bf16 %v4207_v15, %v4206_v16 }
 0x1eb   :  { %4048 = vmatprep.subr.bf16.mxu1 %v4542_v17 }
 0x1ec   :  { %3845 = vmatmul.mubr.msk.f32.vlgmr.msra.gmra.mrb[12].mxu0 %vm168_vm1, %v4469_v32 }
 0x1ed   :  { %4054 = vmatpush3.bf16.msra.mxu0 %v4051_v13  ;;  %v1098_v13 = vlaneseq }
 0x1ee   :  { %4060 = vmatprep.subr.bf16.mxu0 %v4547_v18 }
 0x24b   :  { %v3797_v19 = vpop.f32.mrb[4].mxu0 }
 0x24c   :  { %v862_v20 = vmul.f32 0.35355338, %v3797_v19  ;;  %v243_v21 = vpop.f32.mrb[5].mxu0  ;;  %v1097_v19 = vunpack.c.0.s8 %v1096_v12 }
 0x24d   :  { %v861_v22 = vmul.f32 0.35355338, %v243_v21 }
 0x24e   :  { %v879_v23 = vsel %vm877_vm3, %v862_v20, -inf }
 0x24f   :  { %v878_v24 = vsel %vm877_vm3, %v861_v22, -inf }
 0x250   :  { %v880_v25 = vmax.f32 %v878_v24, %v879_v23  ;;  %v4334_v23 = vmov 0.0  }
 0x252   :  { %v881_v26 = vrot.slane %v880_v25, 4 }
 0x254   :  { %v882_v27 = vmax.f32 %v880_v25, %v881_v26  ;;  %v3804_v28 = vpop.f32.mrb[6].mxu0 }
 0x255   :  { %v864_v29 = vmul.f32 0.35355338, %v3804_v28  ;;  %v330_v30 = vpop.f32.mrb[7].mxu0 }
 0x256   :  { %v883_v31 = vrot.slane %v882_v27, 2  ;;  %v863_v32 = vmul.f32 0.35355338, %v330_v30 }
 0x257   :  { %v888_v33 = vsel %vm877_vm3, %v864_v29, -inf }
 0x258   :  { %v884_v34 = vmax.f32 %v882_v27, %v883_v31  ;;  %v887_v35 = vsel %vm877_vm3, %v863_v32, -inf }
 0x259   :  { %v889_v36 = vmax.f32 %v887_v35, %v888_v33 }
 0x25a   :  { %v885_v37 = vrot.slane %v884_v34, 1 }
 0x25b   :  { %v890_v38 = vrot.slane %v889_v36, 4 }
 0x25c   :  { %v886_v39 = vmax.f32 %v884_v34, %v885_v37 }
 0x25d   :  { %v891_v40 = vmax.f32 %v889_v36, %v890_v38 }
 0x25e   :  { %v950_v41 = vsub.f32 %v861_v22, %v886_v39  ;;  %v951_v42 = vsub.f32 %v862_v20, %v886_v39  ;;  %v4560_v20 = vshrl.u32 %v1098_v13, 7 }
 0x25f   :  { %v892_v43 = vrot.slane %v891_v40, 2 }
 0x260   :  { %v966_v44 = vmul.f32 1.442695, %v950_v41  ;;  %v968_v45 = vmul.f32 1.442695, %v951_v42  ;;  %v4563_v21 = vsub.s32 %v1097_v19, %v4560_v20 }
 0x261   :  { %v893_v46 = vmax.f32 %v891_v40, %v892_v43 }
 0x262   :  { %4228 = vpow2.f32 %v966_v44 }
 0x263   :  { %4230 = vpow2.f32 %v968_v45  ;;  %v894_v47 = vrot.slane %v893_v46, 1 }
 0x265   :  { %v895_v48 = vmax.f32 %v893_v46, %v894_v47 }
 0x267   :  { %v952_v49 = vsub.f32 %v863_v32, %v895_v48  ;;  %v953_v50 = vsub.f32 %v864_v29, %v895_v48 }
 0x269   :  { %v970_v51 = vmul.f32 1.442695, %v952_v49  ;;  %v972_v52 = vmul.f32 1.442695, %v953_v50 }
 0x26b   :  { %4232 = vpow2.f32 %v970_v51 }
 0x26c   :  { %v4229_v53 = vpop.eup %4228  ;;  %4234 = vpow2.f32 %v972_v52 }
 0x26d   :  { %v4231_v54 = vpop.eup %4230  ;;  %v998_v55 = vsel %vm877_vm3, %v4229_v53, 0.0 }
 0x26e   :  { %v999_v56 = vsel %vm877_vm3, %v4231_v54, 0.0 }
 0x26f   :  { %v1000_v57 = vadd.f32 %v999_v56, %v998_v55 }
 0x271   :  { %v1001_v58 = vrot.slane %v1000_v57, 4 }
 0x273   :  { %v1002_v59 = vadd.f32 %v1001_v58, %v1000_v57 }
 0x275   :  { %v4233_v60 = vpop.eup %4232  ;;  %v1003_v61 = vrot.slane %v1002_v59, 2 }
 0x276   :  { %v4235_v62 = vpop.eup %4234  ;;  %v1007_v63 = vsel %vm877_vm3, %v4233_v60, 0.0 }
 0x277   :  { %v1008_v0 = vsel %vm877_vm3, %v4235_v62, 0.0  ;;  %v1004_v1 = vadd.f32 %v1003_v61, %v1002_v59 }
 0x278   :  { %v1009_v2 = vadd.f32 %v1008_v0, %v1007_v63 }
 0x279   :  { %v1005_v3 = vrot.slane %v1004_v1, 1 }
 0x27a   :  { %v1010_v4 = vrot.slane %v1009_v2, 4 }
 0x27b   :  { %v1006_v5 = vadd.f32 %v1005_v3, %v1004_v1 }
 0x27c   :  { %v1011_v6 = vadd.f32 %v1010_v4, %v1009_v2 }
 0x27d   :  { %4236 = vrcp.f32 %v1006_v5 }
 0x27e   :  { %v1012_v7 = vrot.slane %v1011_v6, 2 }
 0x280   :  { %v1013_v8 = vadd.f32 %v1012_v7, %v1011_v6 }
 0x282   :  { %v1014_v9 = vrot.slane %v1013_v8, 1 }
 0x284   :  { %v1015_v10 = vadd.f32 %v1014_v9, %v1013_v8 }
 0x286   :  { %4238 = vrcp.f32 %v1015_v10 }
 0x287   :  { %v4237_v14 = vpop.eup %4236 }
 0x288   :  { %v1071_v15 = vmul.f32 %v4237_v14, %v4229_v53  ;;  %v1072_v16 = vmul.f32 %v4237_v14, %v4231_v54 }
 0x28a   :  { %1955 = vxpose.xlu1.b32.start [1/2] (short) (narrow) %v1071_v15, 16  ;;  %v1094_v24 = vcombine.high %v1071_v15, %v4334_v23  ;;  %v4567_v27 = vrot.slane %v1071_v15, %v4563_v21  ;;  %v1160_v28 = vcombine.high %v1072_v16, %v4334_v23  ;;  %v4571_v29 = vrot.slane %v1072_v16, %v4563_v21 }
 0x28c   :  { %v4582_v34 = vrot.slane %v1094_v24, %v4563_v21  ;;  %v4596_v40 = vrot.slane %v1160_v28, %v4563_v21 }
 0x28e   :  { %1956 = vxpose.xlu1.b32.end [2/2] (short) (narrow) %v1072_v16, 16 }
 0x290   :  { %v4239_v22 = vpop.eup %4238 }
 0x291   :  { %v1074_v25 = vmul.f32 %v4239_v22, %v4233_v60  ;;  %v1075_v26 = vmul.f32 %v4239_v22, %v4235_v62 }
 0x293   :  { %2074 = vxpose.xlu0.b32.start [1/2] (short) (narrow) %v1074_v25, 16  ;;  %v1109_v30 = vcombine.high %v1074_v25, %v4334_v23  ;;  %v4575_v31 = vrot.slane %v1074_v25, %v4563_v21  ;;  %v1175_v32 = vcombine.high %v1075_v26, %v4334_v23  ;;  %v4579_v33 = vrot.slane %v1075_v26, %v4563_v21 }
 0x295   :  { %v1124_v35 = vcombine.low %v4567_v27, %v4575_v31  ;;  %v1125_v36 = vcombine.high %v4567_v27, %v4575_v31  ;;  %v4589_v37 = vrot.slane %v1109_v30, %v4563_v21  ;;  %v4599_v41 = vrot.slane %v1175_v32, %v4563_v21 }
 0x297   :  { %2075 = vxpose.xlu0.b32.end [2/2] (short) (narrow) %v1075_v26, 16  ;;  %v1140_v42 = vcombine.low %v4582_v34, %v4589_v37  ;;  %v1141_v43 = vcombine.high %v4582_v34, %v4589_v37 }
 0x2ac   :  { %v3811_v46 = vpop.f32.mrb[0].mxu1 }
 0x2ad   :  { %v866_v47 = vmul.f32 0.35355338, %v3811_v46  ;;  %v417_v48 = vpop.f32.mrb[1].mxu1 }
 0x2ae   :  { %v865_v49 = vmul.f32 0.35355338, %v417_v48 }
 0x2af   :  { %v897_v50 = vsel %vm877_vm3, %v866_v47, -inf  ;;  %v3818_v51 = vpop.f32.mrb[8].mxu0 }
 0x2b0   :  { %v896_v52 = vsel %vm877_vm3, %v865_v49, -inf  ;;  %v4611_v53 = vmul.f32 0.35355338, %v3818_v51  ;;  %v504_v54 = vpop.f32.mrb[9].mxu0 }
 0x2b1   :  { %v898_v55 = vmax.f32 %v896_v52, %v897_v50  ;;  %v867_v56 = vmul.f32 0.35355338, %v504_v54 }
 0x2b2   :  { %v906_v57 = vsel %vm877_vm3, %v4611_v53, -inf }
 0x2b3   :  { %v899_v58 = vrot.slane %v898_v55, 4  ;;  %v905_v59 = vsel %vm877_vm3, %v867_v56, -inf }
 0x2b4   :  { %v907_v60 = vmax.f32 %v905_v59, %v906_v57  ;;  %v3825_v61 = vpop.f32.mrb[2].mxu1 }
 0x2b5   :  { %v900_v62 = vmax.f32 %v898_v55, %v899_v58  ;;  %v4616_v63 = vmul.f32 0.35355338, %v3825_v61  ;;  %v591_v0 = vpop.f32.mrb[3].mxu1 }
 0x2b6   :  { %v908_v1 = vrot.slane %v907_v60, 4  ;;  %v4618_v2 = vmul.f32 0.35355338, %v591_v0 }
 0x2b7   :  { %v901_v3 = vrot.slane %v900_v62, 2  ;;  %v915_v4 = vsel %vm877_vm3, %v4616_v63, -inf  ;;  %v3832_v5 = vpop.f32.mrb[10].mxu0 }
 0x2b8   :  { %v909_v6 = vmax.f32 %v907_v60, %v908_v1  ;;  %v914_v7 = vsel %vm877_vm3, %v4618_v2, -inf  ;;  %v4624_v8 = vmul.f32 0.35355338, %v3832_v5  ;;  %v678_v9 = vpop.f32.mrb[11].mxu0 }
 0x2b9   :  { %v902_v10 = vmax.f32 %v900_v62, %v901_v3  ;;  %v916_v11 = vmax.f32 %v914_v7, %v915_v4  ;;  %v4626_v12 = vmul.f32 0.35355338, %v678_v9 }
 0x2ba   :  { %v910_v13 = vrot.slane %v909_v6, 2  ;;  %v924_v14 = vsel %vm877_vm3, %v4624_v8, -inf }
 0x2bb   :  { %v903_v15 = vrot.slane %v902_v10, 1  ;;  %v917_v16 = vrot.slane %v916_v11, 4  ;;  %v923_v19 = vsel %vm877_vm3, %v4626_v12, -inf }
 0x2bc   :  { %v911_v22 = vmax.f32 %v909_v6, %v910_v13  ;;  %v925_v24 = vmax.f32 %v923_v19, %v924_v14  ;;  %v3839_v25 = vpop.f32.mrb[4].mxu1 }
 0x2bd   :  { %v904_v26 = vmax.f32 %v902_v10, %v903_v15  ;;  %v918_v28 = vmax.f32 %v916_v11, %v917_v16  ;;  %v4632_v30 = vmul.f32 0.35355338, %v3839_v25  ;;  %v765_v32 = vpop.f32.mrb[5].mxu1 }
 0x2be   :  { %v912_v46 = vrot.slane %v911_v22, 1  ;;  %v926_v48 = vrot.slane %v925_v24, 4  ;;  %v4634_v50 = vmul.f32 0.35355338, %v765_v32 }
 0x2bf   :  { %v954_v51 = vsub.f32 %v865_v49, %v904_v26  ;;  %v955_v52 = vsub.f32 %v866_v47, %v904_v26  ;;  %v919_v54 = vrot.slane %v918_v28, 2  ;;  %v933_v55 = vsel %vm877_vm3, %v4632_v30, -inf  ;;  %v3846_v57 = vpop.f32.mrb[12].mxu0 }
 0x2c0   :  { %v913_v58 = vmax.f32 %v911_v22, %v912_v46  ;;  %v927_v59 = vmax.f32 %v925_v24, %v926_v48  ;;  %v932_v60 = vsel %vm877_vm3, %v4634_v50, -inf  ;;  %v4640_v61 = vmul.f32 0.35355338, %v3846_v57  ;;  %v852_v62 = vpop.f32.mrb[13].mxu0 }
 0x2c1   :  { %v974_v0 = vmul.f32 1.442695, %v954_v51  ;;  %v976_v1 = vmul.f32 1.442695, %v955_v52  ;;  %v920_v3 = vmax.f32 %v918_v28, %v919_v54  ;;  %v934_v4 = vmax.f32 %v932_v60, %v933_v55 }
 0x2c2   :  { %v956_v5 = vsub.f32 %v867_v56, %v913_v58  ;;  %v957_v47 = vsub.f32 %v4611_v53, %v913_v58  ;;  %v928_v49 = vrot.slane %v927_v59, 2  ;;  %v942_v6 = vsel %vm877_vm3, %v4640_v61, -inf }
 0x2c3   :  { %4240 = vpow2.f32 %v974_v0  ;;  %v921_v7 = vrot.slane %v920_v3, 1  ;;  %v935_v9 = vrot.slane %v934_v4, 4  ;;  %v875_v10 = vmul.f32 0.35355338, %v852_v62 }
 0x2c4   :  { %4242 = vpow2.f32 %v976_v1  ;;  %v978_v11 = vmul.f32 1.442695, %v956_v5  ;;  %v980_v13 = vmul.f32 1.442695, %v957_v47  ;;  %v929_v14 = vmax.f32 %v927_v59, %v928_v49 }
 0x2c5   :  { %v922_v15 = vmax.f32 %v920_v3, %v921_v7  ;;  %v936_v16 = vmax.f32 %v934_v4, %v935_v9  ;;  %v941_v19 = vsel %vm877_vm3, %v875_v10, -inf }
 0x2c6   :  { %4244 = vpow2.f32 %v978_v11  ;;  %v930_v56 = vrot.slane %v929_v14, 1  ;;  %v943_v22 = vmax.f32 %v941_v19, %v942_v6 }
 0x2c7   :  { %4246 = vpow2.f32 %v980_v13  ;;  %v958_v53 = vsub.f32 %v4618_v2, %v922_v15  ;;  %v959_v24 = vsub.f32 %v4616_v63, %v922_v15  ;;  %v937_v25 = vrot.slane %v936_v16, 2 }
 0x2c8   :  { %v931_v26 = vmax.f32 %v929_v14, %v930_v56  ;;  %v944_v28 = vrot.slane %v943_v22, 4 }
 0x2c9   :  { %v982_v32 = vmul.f32 1.442695, %v958_v53  ;;  %v984_v46 = vmul.f32 1.442695, %v959_v24  ;;  %v938_v48 = vmax.f32 %v936_v16, %v937_v25 }
 0x2ca   :  { %v960_v51 = vsub.f32 %v4626_v12, %v931_v26  ;;  %v961_v52 = vsub.f32 %v4624_v8, %v931_v26  ;;  %v945_v54 = vmax.f32 %v943_v22, %v944_v28 }
 0x2cb   :  { %4248 = vpow2.f32 %v982_v32  ;;  %v939_v55 = vrot.slane %v938_v48, 1 }
 0x2cc   :  { %4250 = vpow2.f32 %v984_v46  ;;  %v986_v57 = vmul.f32 1.442695, %v960_v51  ;;  %v988_v58 = vmul.f32 1.442695, %v961_v52  ;;  %v946_v59 = vrot.slane %v945_v54, 2 }
 0x2cd   :  { %v4650_v2 = vpop.eup %4240  ;;  %v940_v63 = vmax.f32 %v938_v48, %v939_v55 }
 0x2ce   :  { %v4652_v60 = vpop.eup %4242  ;;  %v1016_v62 = vsel %vm877_vm3, %v4650_v2, 0.0  ;;  %4252 = vpow2.f32 %v986_v57  ;;  %v947_v0 = vmax.f32 %v945_v54, %v946_v59 }
 0x2cf   :  { %v1017_v8 = vsel %vm877_vm3, %v4652_v60, 0.0  ;;  %4254 = vpow2.f32 %v988_v58  ;;  %v962_v12 = vsub.f32 %v4634_v50, %v940_v63  ;;  %v963_v1 = vsub.f32 %v4632_v30, %v940_v63 }
 0x2d0   :  { %v4660_v3 = vpop.eup %4244  ;;  %v1018_v4 = vadd.f32 %v1017_v8, %v1016_v62  ;;  %v948_v5 = vrot.slane %v947_v0, 1 }
 0x2d1   :  { %v4662_v47 = vpop.eup %4246  ;;  %v1025_v49 = vsel %vm877_vm3, %v4660_v3, 0.0  ;;  %v990_v6 = vmul.f32 1.442695, %v962_v12  ;;  %v992_v7 = vmul.f32 1.442695, %v963_v1 }
 0x2d2   :  { %v1019_v9 = vrot.slane %v1018_v4, 4  ;;  %v1026_v11 = vsel %vm877_vm3, %v4662_v47, 0.0  ;;  %v949_v13 = vmax.f32 %v947_v0, %v948_v5 }
 0x2d3   :  { %v1027_v14 = vadd.f32 %v1026_v11, %v1025_v49  ;;  %4256 = vpow2.f32 %v990_v6 }
 0x2d4   :  { %v1020_v50 = vadd.f32 %v1019_v9, %v1018_v4  ;;  %4258 = vpow2.f32 %v992_v7  ;;  %v964_v30 = vsub.f32 %v875_v10, %v949_v13  ;;  %v965_v15 = vsub.f32 %v4640_v61, %v949_v13 }
 0x2d5   :  { %v4669_v16 = vpop.eup %4248  ;;  %v1028_v19 = vrot.slane %v1027_v14, 4 }
 0x2d6   :  { %v4671_v56 = vpop.eup %4250  ;;  %v1034_v22 = vsel %vm877_vm3, %v4669_v16, 0.0  ;;  %v994_v53 = vmul.f32 1.442695, %v964_v30  ;;  %v996_v24 = vmul.f32 1.442695, %v965_v15  ;;  %v1021_v25 = vrot.slane %v1020_v50, 2 }
 0x2d7   :  { %v1029_v26 = vadd.f32 %v1028_v19, %v1027_v14  ;;  %v1035_v28 = vsel %vm877_vm3, %v4671_v56, 0.0 }
 0x2d8   :  { %v4677_v32 = vpop.eup %4252  ;;  %v1036_v10 = vadd.f32 %v1035_v28, %v1034_v22  ;;  %4260 = vpow2.f32 %v994_v53  ;;  %v1022_v61 = vadd.f32 %v1021_v25, %v1020_v50 }
 0x2d9   :  { %v4679_v46 = vpop.eup %4254  ;;  %v1043_v48 = vsel %vm877_vm3, %v4677_v32, 0.0  ;;  %4262 = vpow2.f32 %v996_v24  ;;  %v1030_v51 = vrot.slane %v1029_v26, 2 }
 0x2da   :  { %v1037_v52 = vrot.slane %v1036_v10, 4  ;;  %v1044_v54 = vsel %vm877_vm3, %v4679_v46, 0.0  ;;  %v1023_v55 = vrot.slane %v1022_v61, 1 }
 0x2db   :  { %v1045_v57 = vadd.f32 %v1044_v54, %v1043_v48  ;;  %v1031_v58 = vadd.f32 %v1030_v51, %v1029_v26 }
 0x2dc   :  { %v1038_v59 = vadd.f32 %v1037_v52, %v1036_v10  ;;  %v1024_v63 = vadd.f32 %v1023_v55, %v1022_v61 }
 0x2dd   :  { %v4685_v62 = vpop.eup %4256  ;;  %v1046_v0 = vrot.slane %v1045_v57, 4  ;;  %v1032_v8 = vrot.slane %v1031_v58, 1 }
 0x2de   :  { %v4687_v12 = vpop.eup %4258  ;;  %v1052_v1 = vsel %vm877_vm3, %v4685_v62, 0.0  ;;  %4264 = vrcp.f32 %v1024_v63  ;;  %v1039_v4 = vrot.slane %v1038_v59, 2 }
 0x2df   :  { %v1047_v5 = vadd.f32 %v1046_v0, %v1045_v57  ;;  %v1053_v49 = vsel %vm877_vm3, %v4687_v12, 0.0  ;;  %v1033_v6 = vadd.f32 %v1032_v8, %v1031_v58 }
 0x2e0   :  { %v1054_v7 = vadd.f32 %v1053_v49, %v1052_v1  ;;  %v1040_v9 = vadd.f32 %v1039_v4, %v1038_v59 }
 0x2e1   :  { %4266 = vrcp.f32 %v1033_v6  ;;  %v1048_v11 = vrot.slane %v1047_v5, 2 }
 0x2e2   :  { %v4693_v13 = vpop.eup %4260  ;;  %v1055_v14 = vrot.slane %v1054_v7, 4  ;;  %v1041_v50 = vrot.slane %v1040_v9, 1 }
 0x2e3   :  { %v4695_v30 = vpop.eup %4262  ;;  %v1061_v15 = vsel %vm877_vm3, %v4693_v13, 0.0  ;;  %v1049_v19 = vadd.f32 %v1048_v11, %v1047_v5 }
 0x2e4   :  { %v1056_v22 = vadd.f32 %v1055_v14, %v1054_v7  ;;  %v1062_v53 = vsel %vm877_vm3, %v4695_v30, 0.0  ;;  %v1042_v24 = vadd.f32 %v1041_v50, %v1040_v9 }
 0x2e5   :  { %v1063_v25 = vadd.f32 %v1062_v53, %v1061_v15  ;;  %v1050_v26 = vrot.slane %v1049_v19, 1 }
 0x2e6   :  { %4268 = vrcp.f32 %v1042_v24  ;;  %v1057_v28 = vrot.slane %v1056_v22, 2 }
 0x2e7   :  { %v1064_v10 = vrot.slane %v1063_v25, 4  ;;  %v1051_v61 = vadd.f32 %v1050_v26, %v1049_v19 }
 0x2e8   :  { %v4265_v48 = vpop.eup %4264  ;;  %v1058_v51 = vadd.f32 %v1057_v28, %v1056_v22 }
 0x2e9   :  { %v1065_v52 = vadd.f32 %v1064_v10, %v1063_v25  ;;  %v1077_v54 = vmul.f32 %v4265_v48, %v4650_v2  ;;  %v1078_v55 = vmul.f32 %v4265_v48, %v4652_v60  ;;  %4270 = vrcp.f32 %v1051_v61 }
 0x2ea   :  { %v1059_v57 = vrot.slane %v1058_v51, 1 }
 0x2eb   :  { %v4267_v58 = vpop.eup %4266  ;;  %v1226_v59 = vcombine.high %v1077_v54, %v4334_v23  ;;  %2193 = vxpose.xlu0.b32.start [1/2] (short) (narrow) %v1077_v54, 16  ;;  %v1066_v1 = vrot.slane %v1065_v52, 2  ;;  %v4707_v4 = vrot.slane %v1077_v54, %v4563_v21  ;;  %v4714_v5 = vrot.slane %v1078_v55, %v4563_v21 }
 0x2ec   :  { %v1080_v63 = vmul.f32 %v4267_v58, %v4660_v3  ;;  %v1081_v0 = vmul.f32 %v4267_v58, %v4662_v47  ;;  %v1060_v8 = vadd.f32 %v1059_v57, %v1058_v51  ;;  %v1292_v26 = vcombine.high %v1078_v55, %v4334_v23 }
 0x2ed   :  { %v1067_v3 = vadd.f32 %v1066_v1, %v1065_v52  ;;  %v4720_v47 = vrot.slane %v1226_v59, %v4563_v21 }
 0x2ee   :  { %2312 = vxpose.xlu1.b32.start [1/2] (short) (narrow) %v1080_v63, 16  ;;  %v1241_v2 = vcombine.high %v1080_v63, %v4334_v23  ;;  %v4711_v60 = vrot.slane %v1080_v63, %v4563_v21  ;;  %v4717_v49 = vrot.slane %v1081_v0, %v4563_v21  ;;  %4272 = vrcp.f32 %v1060_v8 }
 0x2ef   :  { %2194 = vxpose.xlu0.b32.end [2/2] (short) (narrow) %v1078_v55, 16  ;;  %v1068_v19 = vrot.slane %v1067_v3, 1  ;;  %v1307_v10 = vcombine.high %v1081_v0, %v4334_v23  ;;  %v4765_v58 = vrot.slane %v1292_v26, %v4563_v21 }
 0x2f0   :  { %v4269_v6 = vpop.eup %4268  ;;  %v1256_v7 = vcombine.low %v4707_v4, %v4711_v60  ;;  %v1257_v9 = vcombine.high %v4707_v4, %v4711_v60  ;;  %v4727_v11 = vrot.slane %v1241_v2, %v4563_v21  ;;  %v1322_v14 = vcombine.low %v4714_v5, %v4717_v49 }
 0x2f1   :  { %v1083_v50 = vmul.f32 %v4269_v6, %v4669_v16  ;;  %v1084_v15 = vmul.f32 %v4269_v6, %v4671_v56  ;;  %v1323_v22 = vcombine.high %v4714_v5, %v4717_v49  ;;  %v1069_v56 = vadd.f32 %v1068_v19, %v1067_v3 }
 0x2f2   :  { %2313 = vxpose.xlu1.b32.end [2/2] (short) (narrow) %v1081_v0, 16  ;;  %v1272_v53 = vcombine.low %v4720_v47, %v4727_v11  ;;  %v1273_v24 = vcombine.high %v4720_v47, %v4727_v11  ;;  %v4771_v0 = vrot.slane %v1307_v10, %v4563_v21 }
 0x2f3   :  { %v4271_v25 = vpop.eup %4270  ;;  %2431 = vxpose.xlu0.b32.start [1/2] (short) (narrow) %v1083_v50, 16  ;;  %v1358_v61 = vcombine.high %v1083_v50, %v4334_v23  ;;  %v4745_v48 = vrot.slane %v1083_v50, %v4563_v21  ;;  %4274 = vrcp.f32 %v1069_v56 }
 0x2f4   :  { %v1086_v28 = vmul.f32 %v4271_v25, %v4677_v32  ;;  %v1087_v16 = vmul.f32 %v4271_v25, %v4679_v46  ;;  %v4755_v32 = vrot.slane %v1084_v15, %v4563_v21  ;;  %v1424_v25 = vcombine.high %v1084_v15, %v4334_v23 }
 0x2f5   :  { %v4768_v63 = vrot.slane %v1358_v61, %v4563_v21 }
 0x2f6   :  { %2550 = vxpose.xlu1.b32.start [1/2] (short) (narrow) %v1086_v28, 16  ;;  %v1373_v51 = vcombine.high %v1086_v28, %v4334_v23  ;;  %v4749_v52 = vrot.slane %v1086_v28, %v4563_v21  ;;  %v4752_v54 = vrot.slane %v1087_v16, %v4563_v21  ;;  %v1439_v26 = vcombine.high %v1087_v16, %v4334_v23 }
 0x2f7   :  { %2432 = vxpose.xlu0.b32.end [2/2] (short) (narrow) %v1084_v15, 16  ;;  %v4791_v10 = vrot.slane %v1424_v25, %v4563_v21  ;;  %v4839_v25 = vpop.permute.xlu0 %4209 }
 0x2f8   :  { %v1388_v46 = vcombine.low %v4745_v48, %v4749_v52  ;;  %v1389_v55 = vcombine.high %v4745_v48, %v4749_v52  ;;  %v4762_v57 = vrot.slane %v1373_v51, %v4563_v21  ;;  %v4273_v59 = vpop.eup %4272  ;;  %v4794_v61 = vrot.slane %v1439_v26, %v4563_v21 }
 0x2f9   :  { %v1089_v2 = vmul.f32 %v4273_v59, %v4685_v62  ;;  %v1090_v3 = vmul.f32 %v4273_v59, %v4687_v12  ;;  %v4215_v62 = vpop.permute.xlu1 %4214 }
 0x2fa   :  { %2551 = vxpose.xlu1.b32.end [2/2] (short) (narrow) %v1087_v16, 16  ;;  %v1404_v6 = vcombine.low %v4768_v63, %v4762_v57  ;;  %v4217_v28 = vunpack.i.h.bf16 %v4215_v62  ;;  %v4216_v38 = vunpack.i.l.bf16 %v4215_v62  ;;  %v5375_v5 = vcombine.high %v4768_v63, %v4762_v57 }
 0x2fb   :  { %2669 = vxpose.xlu0.b32.start [1/2] (short) (narrow) %v1089_v2, 16  ;;  %v1490_v56 = vcombine.high %v1089_v2, %v4334_v23  ;;  %v1556_v15 = vcombine.high %v1090_v3, %v4334_v23  ;;  %v4800_v59 = vrot.slane %v1089_v2, %v4563_v21  ;;  %v4803_v45 = vrot.slane %v1090_v3, %v4563_v21 }
 0x2fc   :  { %v5377_v57 = vcombine.low %v4571_v29, %v4579_v33 }
 0x2fd   :  { %v4275_v12 = vpop.eup %4274  ;;  %v4818_v2 = vrot.slane %v1490_v56, %v4563_v21  ;;  %v4832_v8 = vrot.slane %v1556_v15, %v4563_v21 }
 0x2fe   :  { %v1092_v51 = vmul.f32 %v4275_v12, %v4693_v13  ;;  %v1093_v16 = vmul.f32 %v4275_v12, %v4695_v30 }
 0x2ff   :  { %2670 = vxpose.xlu0.b32.end [2/2] (short) (narrow) %v1090_v3, 16  ;;  %v4220_v3 = vpop.permute.xlu1 %4219 }
 0x300   :  { %2788 = vxpose.xlu1.b32.start [1/2] (short) (narrow) %v1092_v51, 16  ;;  %v1505_v26 = vcombine.high %v1092_v51, %v4334_v23  ;;  %v1571_v13 = vcombine.high %v1093_v16, %v4334_v23  ;;  %v4812_v1 = vrot.slane %v1092_v51, %v4563_v21  ;;  %v4815_v30 = vrot.slane %v1093_v16, %v4563_v21 }
 0x301   :  { %v4222_v12 = vunpack.i.h.bf16 %v4220_v3  ;;  %v4335_v51 = vmov 1934713408  }
 0x302   :  { %v4827_v39 = vrot.slane %v1505_v26, %v4563_v21  ;;  %v4835_v56 = vrot.slane %v1571_v13, %v4563_v21  ;;  %v4848_v13 = vpop.permute.xlu0 %4224  ;;  %v4221_v26 = vunpack.i.l.bf16 %v4220_v3  ;;  %v1127_v50 = vunpack.c.l.s4 %v4335_v51 }
 0x303   :  { %v5378_v51 = vcombine.high %v4765_v58, %v4771_v0 }
 0x304   :  { %2789 = vxpose.xlu1.b32.end [2/2] (short) (narrow) %v1093_v16, 16  ;;  %v4055_v16 = vpack.c.bf16 %v4217_v28, %v4216_v38  ;;  %v4853_v62 = vpack.c.bf16 %v4222_v12, %v4221_v26  ;;  %v1128_v38 = vunpack.c.0.s8 %v1127_v50 }
 0x306   :  { %v4858_v28 = vsub.s32 %v1128_v38, %v4560_v20 }
 0x308   :  { %v4878_v20 = vrot.slane %v1388_v46, %v4858_v28  ;;  %v1271_v46 = vrot.slane %v1257_v9, %v4858_v28  ;;  %v1403_v3 = vrot.slane %v1389_v55, %v4858_v28  ;;  %v1280_v31 = vrot.slane %v1272_v53, %v4858_v28 }
 0x309   :  { %v1148_v60 = vrot.slane %v1140_v42, %v4858_v28  ;;  %v1287_v9 = vrot.slane %v1273_v24, %v4858_v28  ;;  %v1412_v53 = vrot.slane %v1404_v6, %v4858_v28  ;;  %v4934_v42 = vrot.slane %v1322_v14, %v4858_v28 }
 0x30a   :  { %v1971_v15 = vpop.trf.xlu1  ;;  %v1420_v50 = vcombine.high %v4878_v20, %v4334_v23  ;;  %v1289_v12 = vcombine.high %v1271_v46, %v4334_v23  ;;  %v1290_v4 = vcombine.high %v1280_v31, %v4334_v23  ;;  %v1337_v14 = vrot.slane %v1323_v22, %v4858_v28 }
 0x30b   :  { %3851 = vmatprep.mubr.msk.f32.mxu1 %vm877_vm3, %v1971_v15  ;;  %v1291_v48 = vcombine.high %v1287_v9, %v4334_v23  ;;  %v1158_v47 = vcombine.high %v1148_v60, %v4334_v23  ;;  %v1354_v11 = vcombine.high %v4934_v42, %v4334_v23  ;;  %v1422_v24 = vcombine.high %v1412_v53, %v4334_v23 }
 0x30c   :  { %v1155_v52 = vrot.slane %v1141_v43, %v4858_v28  ;;  %v1355_v55 = vcombine.high %v1337_v14, %v4334_v23  ;;  %v1419_v49 = vrot.slane %v5375_v5, %v4858_v28  ;;  %v5376_v22 = vcombine.low %v4765_v58, %v4771_v0 }
 0x30d   :  { %v4976_v63 = vrot.slane %v5377_v57, %v4858_v28  ;;  %v1353_v26 = vrot.slane %v5378_v51, %v4858_v28  ;;  %v5380_v0 = vcombine.high %v4800_v59, %v4812_v1  ;;  %v5388_v5 = vcombine.low %v4803_v45, %v4815_v30 }
 0x30e   :  { %v1972_v21 = vpop.trf.xlu1  ;;  %v1346_v6 = vrot.slane %v5376_v22, %v4858_v28  ;;  %v1159_v34 = vcombine.high %v1155_v52, %v4334_v23  ;;  %v1423_v43 = vcombine.high %v1419_v49, %v4334_v23  ;;  %v5390_v57 = vcombine.low %v4832_v8, %v4835_v56 }
 0x30f   :  { %3852 = vmatmul.mubr.msk.f32.vlgmr.msra.gmra.mrb[6].mxu1 %vm877_vm3, %v1972_v21  ;;  %v1222_v15 = vcombine.high %v4976_v63, %v4334_v23  ;;  %v5379_v21 = vcombine.low %v4755_v32, %v4752_v54  ;;  %v1357_v38 = vcombine.high %v1353_v26, %v4334_v23 }
 0x310   :  { %4050 = vmatpush3.bf16.msra.mxu1 %v4542_v17  ;;  %v4864_v17 = vrot.slane %v1256_v7, %v4858_v28  ;;  %v1356_v37 = vcombine.high %v1346_v6, %v4334_v23  ;;  %v1610_v51 = vrot.slane %v5390_v57, %v4858_v28 }
 0x311   :  { %4056 = vmatprep.subr.bf16.mxu1 %v4055_v16 }
 0x313   :  { %v2090_v44 = vpop.trf.xlu0 }
 0x314   :  { %3858 = vmatprep.mubr.msk.f32.mxu1 %vm877_vm3, %v2090_v44  ;;  %v4870_v44 = vrot.slane %v1124_v35, %v4858_v28  ;;  %v1139_v35 = vrot.slane %v1125_v36, %v4858_v28  ;;  %v1421_v36 = vcombine.high %v1403_v3, %v4334_v23 }
 0x316   :  { %v1156_v7 = vcombine.high %v4870_v44, %v4334_v23  ;;  %v1157_v27 = vcombine.high %v1139_v35, %v4334_v23 }
 0x317   :  { %v2091_v19 = vpop.trf.xlu0 }
 0x318   :  { %3859 = vmatmul.mubr.msk.f32.vlgmr.msra.gmra.mrb[8].mxu1 %vm877_vm3, %v2091_v19  ;;  %v1288_v19 = vcombine.high %v4864_v17, %v4334_v23 }
 0x319   :  { %4058 = vmatpush3.bf16.msra.mxu1 %v4055_v16  ;;  %v4990_v16 = vrot.slane %v5379_v21, %v4858_v28 }
 0x31a   :  { %4064 = vmatprep.subr.bf16.mxu1 %v4853_v62 }
 0x31b   :  { %v1486_v58 = vcombine.high %v4990_v16, %v4334_v23 }
 0x322   :  { %1628 = vrot.lane.b32.xlu1 %v1288_v19, %s4336_s25  ;;  %v1535_v19 = vrot.slane %v5380_v0, %v4858_v28 }
 0x326   :  { %1630 = vrot.lane.b32.xlu1 %v1420_v50, %s4336_s25 }
 0x328   :  { %1626 = vrot.lane.b32.xlu0 %v1156_v7, %s4336_s25  ;;  %v5381_v7 = vcombine.high %v4571_v29, %v4579_v33  ;;  %v5384_v29 = vcombine.high %v4755_v32, %v4752_v54  ;;  %v4227_v32 = vunpack.i.h.bf16 %v4848_v13 }
 0x32a   :  { %1644 = vrot.lane.b32.xlu1 %v1271_v46, %s4337_s26  ;;  %v1205_v50 = vrot.slane %v5381_v7, %v4858_v28  ;;  %v1469_v33 = vrot.slane %v5384_v29, %v4858_v28 }
 0x32c   :  { %1642 = vrot.lane.b32.xlu0 %v1139_v35, %s4337_s26  ;;  %v5382_v35 = vcombine.high %v4803_v45, %v4815_v30 }
 0x32e   :  { %1660 = vrot.lane.b32.xlu1 %v1289_v12, %s4338_s27  ;;  %v1601_v46 = vrot.slane %v5382_v35, %v4858_v28 }
 0x330   :  { %1646 = vrot.lane.b32.xlu0 %v1403_v3, %s4337_s26  ;;  %v5383_v3 = vcombine.low %v4800_v59, %v4812_v1  ;;  %v1223_v1 = vcombine.high %v1205_v50, %v4334_v23  ;;  %v4212_v59 = vunpack.i.h.bf16 %v4839_v25 }
 0x332   :  { %1676 = vrot.lane.b32.xlu1 %v1280_v31, %s4331_s23  ;;  %v5015_v12 = vrot.slane %v5383_v3, %v4858_v28 }
 0x334   :  { %1658 = vrot.lane.b32.xlu0 %v1157_v27, %s4338_s27  ;;  %v1552_v27 = vcombine.high %v5015_v12, %v4334_v23 }
 0x336   :  { %1692 = vrot.lane.b32.xlu1 %v1290_v4, %s4339_s28  ;;  %v1553_v4 = vcombine.high %v1535_v19, %v4334_v23 }
 0x338   :  { %1662 = vrot.lane.b32.xlu0 %v1421_v36, %s4338_s27  ;;  %v4211_v36 = vunpack.i.l.bf16 %v4839_v25  ;;  %v5385_v25 = vcombine.low %v4818_v2, %v4827_v39 }
 0x33a   :  { %1708 = vrot.lane.b32.xlu1 %v1287_v9, %s4332_s24 }
 0x33c   :  { %1674 = vrot.lane.b32.xlu0 %v1148_v60, %s4331_s23  ;;  %v4226_v60 = vunpack.i.l.bf16 %v4848_v13 }
 0x33e   :  { %1724 = vrot.lane.b32.xlu1 %v1291_v48, %s4329_s21  ;;  %v4067_v48 = vpack.c.bf16 %v4212_v59, %v4211_v36 }
 0x340   :  { %1678 = vrot.lane.b32.xlu0 %v1412_v53, %s4331_s23  ;;  %v1487_v53 = vcombine.high %v1469_v33, %v4334_v23 }
 0x342   :  { %1740 = vrot.lane.b32.xlu1 %v1354_v11, %s4336_s25  ;;  %v4071_v11 = vpack.c.bf16 %v4227_v32, %v4226_v60 }
 0x344   :  { %1690 = vrot.lane.b32.xlu0 %v1158_v47, %s4339_s28  ;;  %v1544_v47 = vrot.slane %v5385_v25, %v4858_v28 }
 0x346   :  { %1756 = vrot.lane.b32.xlu1 %v1337_v14, %s4337_s26  ;;  %v5386_v14 = vcombine.low %v4596_v40, %v4599_v41 }
 0x348   :  { %1694 = vrot.lane.b32.xlu0 %v1422_v24, %s4339_s28 }
 0x34a   :  { %1772 = vrot.lane.b32.xlu1 %v1355_v55, %s4338_s27  ;;  %v5387_v55 = vcombine.high %v4818_v2, %v4827_v39  ;;  %v5389_v39 = vcombine.low %v4791_v10, %v4794_v61 }
 0x34c   :  { %1706 = vrot.lane.b32.xlu0 %v1155_v52, %s4332_s24  ;;  %v1214_v52 = vrot.slane %v5386_v14, %v4858_v28  ;;  %v1478_v2 = vrot.slane %v5389_v39, %v4858_v28 }
 0x34e   :  { %1788 = vrot.lane.b32.xlu1 %v1346_v6, %s4331_s23  ;;  %v1224_v30 = vcombine.high %v1214_v52, %v4334_v23 }
 0x350   :  { %1710 = vrot.lane.b32.xlu0 %v1419_v49, %s4332_s24  ;;  %v5061_v49 = vrot.slane %v5388_v5, %v4858_v28 }
 0x352   :  { %1804 = vrot.lane.b32.xlu1 %v1356_v37, %s4339_s28 }
 0x354   :  { %1722 = vrot.lane.b32.xlu0 %v1159_v34, %s4329_s21  ;;  %v1619_v34 = vcombine.high %v1601_v46, %v4334_v23 }
 0x356   :  { %1820 = vrot.lane.b32.xlu1 %v1353_v26, %s4332_s24 }
 0x358   :  { %1726 = vrot.lane.b32.xlu0 %v1423_v43, %s4329_s21  ;;  %v1488_v43 = vcombine.high %v1478_v2, %v4334_v23 }
 0x35a   :  { %1836 = vrot.lane.b32.xlu1 %v1357_v38, %s4329_s21 }
 0x35c   :  { %1738 = vrot.lane.b32.xlu0 %v1222_v15, %s4336_s25  ;;  %v5391_v15 = vcombine.high %v4596_v40, %v4599_v41  ;;  %v1554_v40 = vcombine.high %v1544_v47, %v4334_v23 }
 0x35e   :  { %1648 = vrot.lane.b32.xlu1 %v1535_v19, %s4337_s26  ;;  %v1221_v21 = vrot.slane %v5391_v15, %v4858_v28  ;;  %v5393_v19 = vcombine.high %v4791_v10, %v4794_v61  ;;  %v5116_v10 = vld [vmem:[%s5366_s2 + $0x8] sm:$0xff] }
 0x360   :  { %1742 = vrot.lane.b32.xlu0 %v1486_v58, %s4336_s25  ;;  %v5392_v58 = vcombine.high %v4832_v8, %v4835_v56  ;;  %v1485_v7 = vrot.slane %v5393_v19, %v4858_v28  ;;  %v1225_v41 = vcombine.high %v1221_v21, %v4334_v23  ;;  %v2907_v56 = vld [vmem:[%s5366_s2] sm:$0xff] }
 0x362   :  { %1760 = vrot.lane.b32.xlu1 %v1601_v46, %s4337_s26  ;;  %v1617_v0 = vrot.slane %v5392_v58, %v4858_v28  ;;  %v1489_v61 = vcombine.high %v1485_v7, %v4334_v23 }
 0x364   :  { %1754 = vrot.lane.b32.xlu0 %v1205_v50, %s4337_s26  ;;  %v1621_v35 = vcombine.high %v1617_v0, %v4334_v23 }
 0x366   :  { %1632 = vrot.lane.b32.xlu1 %v1552_v27, %s4336_s25 }
 0x368   :  { %1758 = vrot.lane.b32.xlu0 %v1469_v33, %s4337_s26 }
 0x36a   :  { %1664 = vrot.lane.b32.xlu1 %v1553_v4, %s4338_s27 }
 0x36b   :  { %v2209_v31 = vpop.trf.xlu0 }
 0x36c   :  { %3865 = vmatprep.mubr.msk.f32.mxu0 %vm877_vm3, %v2209_v31  ;;  %1770 = vrot.lane.b32.xlu0 %v1223_v1, %s4338_s27 }
 0x36e   :  { %v2328_v54 = vpop.trf.xlu1  ;;  %1680 = vrot.lane.b32.xlu1 %v1544_v47, %s4331_s23 }
 0x36f   :  { %v2210_v9 = vpop.trf.xlu0  ;;  %3872 = vmatprep.mubr.msk.f32.mxu1 %vm877_vm3, %v2328_v54 }
 0x370   :  { %3866 = vmatmul.mubr.msk.f32.vlgmr.msra.gmra.mrb[14].mxu0 %vm877_vm3, %v2210_v9  ;;  %1774 = vrot.lane.b32.xlu0 %v1487_v53, %s4338_s27 }
 0x371   :  { %4062 = vmatpush3.bf16.msra.mxu0 %v4547_v18  ;;  %v1551_v18 = vrot.slane %v5387_v55, %v4858_v28  ;;  %v1620_v28 = vcombine.high %v1610_v51, %v4334_v23 }
 0x372   :  { %4068 = vmatprep.subr.bf16.mxu0 %v4067_v48  ;;  %v2329_v13 = vpop.trf.xlu1 }
 0x373   :  { %v2447_v24 = vpop.trf.xlu0  ;;  %3873 = vmatmul.mubr.msk.f32.vlgmr.msra.gmra.mrb[10].mxu1 %vm877_vm3, %v2329_v13  ;;  %1712 = vrot.lane.b32.xlu1 %v1551_v18, %s4332_s24  ;;  %v1555_v8 = vcombine.high %v1551_v18, %v4334_v23 }
 0x374   :  { %4066 = vmatpush3.bf16.msra.mxu1 %v4853_v62  ;;  %3879 = vmatprep.mubr.msk.f32.mxu0 %vm877_vm3, %v2447_v24  ;;  %v1618_v62 = vcombine.high %v5061_v49, %v4334_v23 }
 0x375   :  { %4072 = vmatprep.subr.bf16.mxu1 %v4071_v11  ;;  %1786 = vrot.lane.b32.xlu0 %v1214_v52, %s4331_s23 }
 0x376   :  { %v2566_v22 = vpop.trf.xlu1 }
 0x377   :  { %v2448_v6 = vpop.trf.xlu0  ;;  %3886 = vmatprep.mubr.msk.f32.mxu1 %vm877_vm3, %v2566_v22  ;;  %1744 = vrot.lane.b32.xlu1 %v1618_v62, %s4336_s25 }
 0x378   :  { %3880 = vmatmul.mubr.msk.f32.vlgmr.msra.gmra.mrb[16].mxu0 %vm877_vm3, %v2448_v6 }
 0x379   :  { %4070 = vmatpush3.bf16.msra.mxu0 %v4067_v48  ;;  %1790 = vrot.lane.b32.xlu0 %v1478_v2, %s4331_s23 }
 0x37a   :  { %v2567_v45 = vpop.trf.xlu1  ;;  %3903 = vmatprep.subr.mxu0 %v2907_v56 }
 0x37b   :  { %3887 = vmatmul.mubr.msk.f32.vlgmr.msra.gmra.mrb[12].mxu1 %vm877_vm3, %v2567_v45  ;;  %v2685_v37 = vpop.trf.xlu0  ;;  %1776 = vrot.lane.b32.xlu1 %v1619_v34, %s4338_s27 }
 0x37c   :  { %4074 = vmatpush3.bf16.msra.mxu1 %v4071_v11  ;;  %3893 = vmatprep.mubr.msk.f32.mxu0 %vm877_vm3, %v2685_v37 }
 0x37d   :  { %1802 = vrot.lane.b32.xlu0 %v1224_v30, %s4339_s28 }
 0x37f   :  { %v2686_v26 = vpop.trf.xlu0  ;;  %1792 = vrot.lane.b32.xlu1 %v1610_v51, %s4331_s23 }
 0x380   :  { %3894 = vmatmul.mubr.msk.f32.vlgmr.msra.gmra.mrb[18].mxu0 %vm877_vm3, %v2686_v26  ;;  %v2804_v38 = vpop.trf.xlu1 }
 0x381   :  { %1806 = vrot.lane.b32.xlu0 %v1488_v43, %s4339_s28  ;;  %3900 = vmatprep.mubr.msk.f32.mxu1 %vm877_vm3, %v2804_v38 }
 0x382   :  { %3904 = vmatpush3.msra.mxu0 %v2907_v56 }
 0x383   :  { %1824 = vrot.lane.b32.xlu1 %v1617_v0, %s4332_s24  ;;  %3911 = vmatprep.subr.mxu0 %v5116_v10 }
 0x384   :  { %v2805_v50 = vpop.trf.xlu1 }
 0x385   :  { %1818 = vrot.lane.b32.xlu0 %v1221_v21, %s4332_s24  ;;  %3901 = vmatmul.mubr.msk.f32.vlgmr.msra.gmra.mrb[14].mxu1 %vm877_vm3, %v2805_v50 }
 0x387   :  { %1696 = vrot.lane.b32.xlu1 %v1554_v40, %s4339_s28 }
 0x389   :  { %1822 = vrot.lane.b32.xlu0 %v1485_v7, %s4332_s24 }
 0x38b   :  { %1728 = vrot.lane.b32.xlu1 %v1555_v8, %s4329_s21 }
 0x38d   :  { %1834 = vrot.lane.b32.xlu0 %v1225_v41, %s4329_s21 }
 0x38f   :  { %1808 = vrot.lane.b32.xlu1 %v1620_v28, %s4339_s28 }
 0x391   :  { %1838 = vrot.lane.b32.xlu0 %v1489_v61, %s4329_s21 }
 0x393   :  { %1840 = vrot.lane.b32.xlu1 %v1621_v35, %s4329_s21 }
 0x394   :  { %v1629_v46 = vpop.permute.xlu1 %1628 }
 0x395   :  { %v1847_v30 = vsel %vm877_vm3, %v4864_v17, %v1629_v46 }
 0x398   :  { %v1631_v29 = vpop.permute.xlu1 %1630 }
 0x399   :  { %v1848_v59 = vsel %vm877_vm3, %v4878_v20, %v1631_v29  ;;  %v3315_v29 = vld [vmem:[%s5367_s3] sm:$0xff] }
 0x39a   :  { %v1627_v3 = vpop.permute.xlu0 %1626 }
 0x39b   :  { %v1846_v33 = vsel %vm877_vm3, %v4870_v44, %v1627_v3 }
 0x39c   :  { %v1645_v31 = vpop.permute.xlu1 %1644 }
 0x39d   :  { %v1851_v43 = vsel %vm38_vm0, %v1847_v30, %v1645_v31 }
 0x39e   :  { %v1643_v27 = vpop.permute.xlu0 %1642 }
 0x39f   :  { %v1850_v1 = vsel %vm38_vm0, %v1846_v33, %v1643_v27  ;;  %v3316_v33 = vld [vmem:[%s5367_s3 + $0x8] sm:$0xff] }
 0x3a0   :  { %v1661_v4 = vpop.permute.xlu1 %1660  ;;  %v4075_v31 = vpack.c.bf16 %v3316_v33, %v3315_v29  ;;  %v2910_v33 = vld [vmem:[%s5366_s2 + $0x18] sm:$0xff] }
 0x3a1   :  { %v1856_v26 = vsel %vm1854_vm4, %v1851_v43, %v1661_v4 }
 0x3a2   :  { %v1647_v36 = vpop.permute.xlu0 %1646  ;;  %4076 = vmatprep.subr.bf16.mxu1 %v4075_v31 }
 0x3a3   :  { %v1852_v54 = vsel %vm38_vm0, %v1848_v59, %v1647_v36  ;;  %4078 = vmatpush3.bf16.msra.mxu1 %v4075_v31 }
 0x3a4   :  { %v1677_v32 = vpop.permute.xlu1 %1676 }
 0x3a5   :  { %v1861_v21 = vsel %vm1859_vm5, %v1856_v26, %v1677_v32 }
 0x3a6   :  { %v1659_v23 = vpop.permute.xlu0 %1658 }
 0x3a7   :  { %v1855_v60 = vsel %vm1854_vm4, %v1850_v1, %v1659_v23 }
 0x3a8   :  { %v1693_v53 = vpop.permute.xlu1 %1692 }
 0x3a9   :  { %v1866_v38 = vsel %vm1864_vm6, %v1861_v21, %v1693_v53 }
 0x3aa   :  { %v1663_v9 = vpop.permute.xlu0 %1662 }
 0x3ab   :  { %v1857_v44 = vsel %vm1854_vm4, %v1852_v54, %v1663_v9  ;;  %v5177_v54 = vld [vmem:[%s5366_s2 + $0x10] sm:$0xff] }
 0x3ac   :  { %v1709_v25 = vpop.permute.xlu1 %1708 }
 0x3ad   :  { %v1871_v0 = vsel %vm1869_vm7, %v1866_v38, %v1709_v25 }
 0x3ae   :  { %v1675_v48 = vpop.permute.xlu0 %1674 }
 0x3af   :  { %v1860_v47 = vsel %vm1859_vm5, %v1855_v60, %v1675_v48 }
 0x3b0   :  { %v1725_v20 = vpop.permute.xlu1 %1724 }
 0x3b1   :  { %v1876_v50 = vsel %vm1874_vm8, %v1871_v0, %v1725_v20 }
 0x3b2   :  { %v1679_v13 = vpop.permute.xlu0 %1678 }
 0x3b3   :  { %v1862_v11 = vsel %vm1859_vm5, %v1857_v44, %v1679_v13 }
 0x3b4   :  { %v1741_v14 = vpop.permute.xlu1 %1740 }
 0x3b5   :  { %v1880_v34 = vsel %vm877_vm3, %v4934_v42, %v1741_v14 }
 0x3b6   :  { %v1691_v24 = vpop.permute.xlu0 %1690 }
 0x3b7   :  { %v5138_v52 = vsel %vm1864_vm6, %v1860_v47, %v1691_v24 }
 0x3b8   :  { %v1757_v18 = vpop.permute.xlu1 %1756 }
 0x3b9   :  { %v1884_v57 = vsel %vm38_vm0, %v1880_v34, %v1757_v18 }
 0x3ba   :  { %v1695_v55 = vpop.permute.xlu0 %1694 }
 0x3bb   :  { %v5141_v5 = vsel %vm1864_vm6, %v1862_v11, %v1695_v55 }
 0x3bc   :  { %v1773_v6 = vpop.permute.xlu1 %1772 }
 0x3bd   :  { %v1888_v15 = vsel %vm1854_vm4, %v1884_v57, %v1773_v6 }
 0x3be   :  { %v5143_v22 = vpop.permute.xlu0 %1706 }
 0x3c0   :  { %v1789_v2 = vpop.permute.xlu1 %1788 }
 0x3c1   :  { %v1892_v17 = vsel %vm1859_vm5, %v1888_v15, %v1789_v2  ;;  %v1870_v2 = vsel %vm1869_vm7, %v5138_v52, %v5143_v22 }
 0x3c2   :  { %v5145_v39 = vpop.permute.xlu0 %1710 }
 0x3c3   :  { %v1872_v38 = vsel %vm1869_vm7, %v5141_v5, %v5145_v39 }
 0x3c4   :  { %v1805_v45 = vpop.permute.xlu1 %1804 }
 0x3c5   :  { %v1896_v42 = vsel %vm1864_vm6, %v1892_v17, %v1805_v45 }
 0x3c6   :  { %v5147_v62 = vpop.permute.xlu0 %1722 }
 0x3c7   :  { %v1875_v26 = vsel %vm1874_vm8, %v1870_v2, %v5147_v62  ;;  %v3431_v2 = vld [vmem:[%s5369_s5 + $0x20] sm:$0xff] }
 0x3c8   :  { %v1821_v51 = vpop.permute.xlu1 %1820 }
 0x3c9   :  { %v1900_v19 = vsel %vm1869_vm7, %v1896_v42, %v1821_v51 }
 0x3ca   :  { %v5153_v37 = vpop.permute.xlu0 %1726 }
 0x3cc   :  { %v1837_v7 = vpop.permute.xlu1 %1836 }
 0x3cd   :  { %v1904_v40 = vsel %vm1874_vm8, %v1900_v19, %v1837_v7  ;;  %v1877_v19 = vsel %vm1874_vm8, %v1872_v38, %v5153_v37 }
 0x3ce   :  { %v1739_v58 = vpop.permute.xlu0 %1738  ;;  %v1923_v41 = vcombine.low %v1876_v50, %v1904_v40 }
 0x3d0   :  { %3616 = vst.sshfl [vmem:[#allocation4 + $0x4] sm:$0x33 pattern:$0x76325410] %v1923_v41  ;;  %v1649_v56 = vpop.permute.xlu1 %1648 }
 0x3d2   :  { %v1743_v8 = vpop.permute.xlu0 %1742 }
 0x3d3   :  { %v1881_v45 = vsel %vm877_vm3, %v4990_v16, %v1743_v8 }
 0x3d4   :  { %v1761_v28 = vpop.permute.xlu1 %1760 }
 0x3d6   :  { %v1755_v61 = vpop.permute.xlu0 %1754 }
 0x3d8   :  { %v1633_v46 = vpop.permute.xlu1 %1632 }
 0x3da   :  { %v1759_v35 = vpop.permute.xlu0 %1758 }
 0x3db   :  { %v1885_v34 = vsel %vm38_vm0, %v1881_v45, %v1759_v35  ;;  %v3432_v45 = vld [vmem:[%s5369_s5 + $0x28] sm:$0xff] }
 0x3dc   :  { %v1665_v27 = vpop.permute.xlu1 %1664 }
 0x3de   :  { %v1771_v3 = vpop.permute.xlu0 %1770 }
 0x3e0   :  { %v1681_v4 = vpop.permute.xlu1 %1680 }
 0x3e2   :  { %v3853_v1 = vpop.f32.mrb[6].mxu1  ;;  %v1775_v59 = vpop.permute.xlu0 %1774 }
 0x3e3   :  { %v2065_v36 = vpop.f32.mrb[7].mxu1  ;;  %v1889_v52 = vsel %vm1854_vm4, %v1885_v34, %v1775_v59  ;;  %v3433_v34 = vld [vmem:[%s5369_s5 + $0x30] sm:$0xff] }
 0x3e4   :  { %3905 = vmatprep.mubr.msk.f32.mxu0 %vm168_vm1, %v2065_v36 }
 0x3e5   :  { %3906 = vmatmul.mubr.msk.f32.vlgmr.msra.gmra.mrb[20].mxu0 %vm168_vm1, %v3853_v1  ;;  %v1713_v32 = vpop.permute.xlu1 %1712 }
 0x3e6   :  { %3912 = vmatpush3.msra.mxu0 %v5116_v10  ;;  %v1879_v10 = vsel %vm877_vm3, %v4976_v63, %v1739_v58  ;;  %v1849_v63 = vsel %vm877_vm3, %v5015_v12, %v1633_v46 }
 0x3e7   :  { %v1787_v23 = vpop.permute.xlu0 %1786  ;;  %3919 = vmatprep.subr.mxu0 %v5177_v54  ;;  %v1883_v24 = vsel %vm38_vm0, %v1879_v10, %v1755_v61  ;;  %v1853_v12 = vsel %vm38_vm0, %v1849_v63, %v1649_v56 }
 0x3e8   :  { %v1887_v55 = vsel %vm1854_vm4, %v1883_v24, %v1771_v3  ;;  %v1858_v62 = vsel %vm1854_vm4, %v1853_v12, %v1665_v27  ;;  %v4276_v24 = vld [vmem:[%s5364_s0] sm:$0xff] }
 0x3e9   :  { %v1745_v53 = vpop.permute.xlu1 %1744  ;;  %v1891_v6 = vsel %vm1859_vm5, %v1887_v55, %v1787_v23  ;;  %v1863_v7 = vsel %vm1859_vm5, %v1858_v62, %v1681_v4  ;;  %v4277_v55 = vld [vmem:[%s5364_s0 + $0x8] sm:$0xff]  ;;  %v3439_v62 = vld [vmem:[%s5369_s5 + $0x60] sm:$0xff] }
 0x3ea   :  { %v1882_v43 = vsel %vm877_vm3, %v5061_v49, %v1745_v53  ;;  %v3318_v53 = vld [vmem:[%s5367_s3 + $0x18] sm:$0xff] }
 0x3eb   :  { %v1791_v60 = vpop.permute.xlu0 %1790  ;;  %v3860_v9 = vpop.f32.mrb[8].mxu1  ;;  %v1886_v17 = vsel %vm38_vm0, %v1882_v43, %v1761_v28  ;;  %v3434_v43 = vld [vmem:[%s5369_s5 + $0x38] sm:$0xff] }
 0x3ec   :  { %v2184_v44 = vpop.f32.mrb[9].mxu1  ;;  %v1893_v15 = vsel %vm1859_vm5, %v1889_v52, %v1791_v60  ;;  %v4279_v52 = vld [vmem:[%s5364_s0 + $0x18] sm:$0xff] }
 0x3ed   :  { %3908 = vmatprep.mubr.msk.f32.mxu0 %vm168_vm1, %v2184_v44  ;;  %v1777_v25 = vpop.permute.xlu1 %1776 }
 0x3ee   :  { %3909 = vmatmul.mubr.msk.f32.gmra.mrb[22].mxu0 %vm168_vm1, %v3860_v9  ;;  %v1890_v42 = vsel %vm1854_vm4, %v1886_v17, %v1777_v25  ;;  %v3317_v9 = vld [vmem:[%s5367_s3 + $0x10] sm:$0xff]  ;;  %v3428_v25 = vld [vmem:[%s5369_s5 + $0x8] sm:$0xff] }
 0x3ef   :  { %v1803_v48 = vpop.permute.xlu0 %1802  ;;  %v4079_v44 = vpack.c.bf16 %v3318_v53, %v3317_v9  ;;  %v3437_v17 = vld [vmem:[%s5369_s5 + $0x50] sm:$0xff] }
 0x3f0   :  { %v1895_v30 = vsel %vm1864_vm6, %v1891_v6, %v1803_v48  ;;  %v3427_v48 = vld [vmem:[%s5369_s5] sm:$0xff] }
 0x3f1   :  { %v1793_v13 = vpop.permute.xlu1 %1792  ;;  %4080 = vmatprep.subr.bf16.mxu1 %v4079_v44 }
 0x3f2   :  { %v1894_v50 = vsel %vm1859_vm5, %v1890_v42, %v1793_v13  ;;  %4082 = vmatpush3.bf16.msra.mxu1 %v4079_v44  ;;  %v3440_v42 = vld [vmem:[%s5369_s5 + $0x68] sm:$0xff] }
 0x3f3   :  { %v1807_v47 = vpop.permute.xlu0 %1806 }
 0x3f4   :  { %v1897_v49 = vsel %vm1864_vm6, %v1893_v15, %v1807_v47  ;;  %v4083_v47 = vpack.c.bf16 %v3428_v25, %v3427_v48  ;;  %v3435_v15 = vld [vmem:[%s5369_s5 + $0x40] sm:$0xff] }
 0x3f5   :  { %v1825_v11 = vpop.permute.xlu1 %1824 }
 0x3f6   :  { %4084 = vmatprep.subr.bf16.mxu1 %v4083_v47 }
 0x3f7   :  { %v1819_v20 = vpop.permute.xlu0 %1818 }
 0x3f8   :  { %v1899_v57 = vsel %vm1869_vm7, %v1895_v30, %v1819_v20  ;;  %v3429_v20 = vld [vmem:[%s5369_s5 + $0x10] sm:$0xff]  ;;  %v4091_v30 = vpack.c.bf16 %v3432_v45, %v3431_v2 }
 0x3f9   :  { %v1697_v18 = vpop.permute.xlu1 %1696 }
 0x3fa   :  { %v1868_v5 = vsel %vm1864_vm6, %v1863_v7, %v1697_v18 }
 0x3fb   :  { %v1823_v14 = vpop.permute.xlu0 %1822  ;;  %v1873_v56 = vsel %vm1869_vm7, %v1868_v5, %v1713_v32 }
 0x3fc   :  { %v1901_v58 = vsel %vm1869_vm7, %v1897_v49, %v1823_v14  ;;  %v3438_v49 = vld [vmem:[%s5369_s5 + $0x58] sm:$0xff] }
 0x3fd   :  { %v1729_v22 = vpop.permute.xlu1 %1728  ;;  %v4103_v38 = vpack.c.bf16 %v3438_v49, %v3437_v17 }
 0x3fe   :  { %v1878_v37 = vsel %vm1874_vm8, %v1873_v56, %v1729_v22 }
 0x3ff   :  { %v1835_v51 = vpop.permute.xlu0 %1834 }
 0x400   :  { %v1903_v16 = vsel %vm1874_vm8, %v1899_v57, %v1835_v51  ;;  %v4278_v51 = vld [vmem:[%s5364_s0 + $0x10] sm:$0xff] }
 0x401   :  { %v1915_v21 = vcombine.low %v1875_v26, %v1903_v16  ;;  %v1809_v40 = vpop.permute.xlu1 %1808  ;;  %v4095_v16 = vpack.c.bf16 %v3434_v43, %v3433_v34 }
 0x402   :  { %v1898_v39 = vsel %vm1864_vm6, %v1894_v50, %v1809_v40  ;;  %v3651_v50 = vld [vmem:[%s5368_s4] ss:$0 sm:$0xff] }
 0x403   :  { %3615 = vst.sshfl [vmem:[#allocation4] sm:$0x33 pattern:$0x76325410] %v1915_v21  ;;  %v1839_v0 = vpop.permute.xlu0 %1838  ;;  %v1902_v61 = vsel %vm1869_vm7, %v1898_v39, %v1825_v11  ;;  %v3430_v11 = vld [vmem:[%s5369_s5 + $0x18] sm:$0xff]  ;;  %v3436_v21 = vld [vmem:[%s5369_s5 + $0x48] sm:$0xff] }
 0x404   :  { %v1905_v41 = vsel %vm1874_vm8, %v1901_v58, %v1839_v0  ;;  %v4087_v6 = vpack.c.bf16 %v3430_v11, %v3429_v20  ;;  %v4099_v12 = vpack.c.bf16 %v3436_v21, %v3435_v15  ;;  %v4107_v58 = vpack.c.bf16 %v3440_v42, %v3439_v62  ;;  %v3441_v0 = vld [vmem:[%s5369_s5 + $0x70] sm:$0xff] }
 0x405   :  { %v1931_v8 = vcombine.low %v1877_v19, %v1905_v41  ;;  %v1841_v28 = vpop.permute.xlu1 %1840  ;;  %v3442_v19 = vld [vmem:[%s5369_s5 + $0x78] sm:$0xff]  ;;  %s4340_s5 = smov [#allocation4]  }
 0x406   :  { %v1906_v35 = vsel %vm1874_vm8, %v1902_v61, %v1841_v28  ;;  %v4111_v7 = vpack.c.bf16 %v3442_v19, %v3441_v0  ;;  %s3564_s16 = sshll.u32 %s4340_s5, 4  ;;  %s3565_s16 = int_to_ptr.vmem [resolvable:$true] %s3564_s16 }
 0x407   :  { %3617 = vst.sshfl [vmem:[#allocation4 + $0x8] sm:$0x33 pattern:$0x76325410] %v1931_v8  ;;  %v1939_v46 = vcombine.low %v1878_v37, %v1906_v35  ;;  %s4280_s4 = scalar_lea.vmem %s3565_s16, 256  ;;  %p4285_p1 = scmp.lt.s32.totalorder %s3565_s16, %s3565_s16 }
 0x408   :  { %p4281_p0 = scmp.ne.s32.totalorder %s3565_s16, %s4280_s4  ;;  %p4286_p2 = scmp.lt.s32.totalorder %s4280_s4, %s4280_s4 }
 0x409   :  { %3618 = vst.sshfl [vmem:[#allocation4 + $0xc] sm:$0x33 pattern:$0x76325410] %v1939_v46 }
 0x40a   :  { %p4287_p3 = por %p4286_p2, %p4285_p1 }
 0x40c   :  { %p4288_p4 = pnand %p4287_p3, %p4281_p0 }
 0x443   :  { %v3867_v3 = vpop.f32.mrb[14].mxu0 }
 0x444   :  { %v2303_v29 = vpop.f32.mrb[15].mxu0 }
 0x445   :  { %3913 = vmatprep.mubr.msk.f32.mxu0 %vm168_vm1, %v2303_v29 }
 0x446   :  { %v3874_v27 = vpop.f32.mrb[10].mxu1  ;;  %3914 = vmatmul.mubr.msk.f32.vlgmr.msra.gmra.mrb[20].mxu0 %vm168_vm1, %v3867_v3 }
 0x447   :  { %3920 = vmatpush3.msra.mxu0 %v5177_v54  ;;  %v2422_v31 = vpop.f32.mrb[11].mxu1 }
 0x448   :  { %3916 = vmatprep.mubr.msk.f32.mxu0 %vm168_vm1, %v2422_v31  ;;  %3927 = vmatprep.subr.mxu0 %v2910_v33 }
 0x44a   :  { %3917 = vmatmul.mubr.msk.f32.gmra.mrb[22].mxu0 %vm168_vm1, %v3874_v27 }
 0x44b   :  { %v3881_v1 = vpop.f32.mrb[16].mxu0 }
 0x44c   :  { %v2541_v59 = vpop.f32.mrb[17].mxu0 }
 0x44d   :  { %3921 = vmatprep.mubr.msk.f32.mxu0 %vm168_vm1, %v2541_v59 }
 0x44e   :  { %v3888_v36 = vpop.f32.mrb[12].mxu1  ;;  %3922 = vmatmul.mubr.msk.f32.vlgmr.msra.gmra.mrb[20].mxu0 %vm168_vm1, %v3881_v1 }
 0x44f   :  { %3928 = vmatpush3.msra.mxu0 %v2910_v33  ;;  %v2660_v4 = vpop.f32.mrb[13].mxu1 }
 0x450   :  { %3924 = vmatprep.mubr.msk.f32.mxu0 %vm168_vm1, %v2660_v4 }
 0x452   :  { %3925 = vmatmul.mubr.msk.f32.gmra.mrb[22].mxu0 %vm168_vm1, %v3888_v36 }
 0x453   :  { %v3895_v54 = vpop.f32.mrb[18].mxu0 }
 0x454   :  { %v2779_v23 = vpop.f32.mrb[19].mxu0 }
 0x455   :  { %3929 = vmatprep.mubr.msk.f32.mxu0 %vm168_vm1, %v2779_v23 }
 0x456   :  { %3930 = vmatmul.mubr.msk.f32.vlgmr.msra.gmra.mrb[20].mxu0 %vm168_vm1, %v3895_v54 }
 0x458   :  { %v3902_v32 = vpop.f32.mrb[14].mxu1 }
 0x459   :  { %v2898_v60 = vpop.f32.mrb[15].mxu1 }
 0x45a   :  { %3932 = vmatprep.mubr.msk.f32.mxu0 %vm168_vm1, %v2898_v60 }
 0x45b   :  { %3933 = vmatmul.mubr.msk.f32.gmra.mrb[22].mxu0 %vm168_vm1, %v3902_v32 }
 0x529   :  { %v3931_v13 = vpop.f32.mrb[20].mxu0 }
 0x52a   :  { %v3292_v10 = vpop.f32.mrb[21].mxu0  ;;  %v5268_v18 = vadd.f32 %v4277_v55, %v3931_v13 }
 0x52b   :  { %v5263_v14 = vadd.f32 %v4276_v24, %v3292_v10 }
 0x52d   :  { %3943 = vmatprep.mubr.msk.f32.mxu1 %vm38_vm0, %v5263_v14 }
 0x52e   :  { %3944 = vmatmul.mubr.msk.f32.vlgmr.msra.gmra.mrb[16].mxu1 %vm38_vm0, %v5268_v18  ;;  %v3934_v63 = vpop.f32.mrb[22].mxu0 }
 0x52f   :  { %4086 = vmatpush3.bf16.msra.mxu1 %v4083_v47  ;;  %v3302_v57 = vpop.f32.mrb[23].mxu0  ;;  %v5294_v22 = vadd.f32 %v4279_v52, %v3934_v63 }
 0x530   :  { %4088 = vmatprep.subr.bf16.mxu1 %v4087_v6  ;;  %v5289_v26 = vadd.f32 %v4278_v51, %v3302_v57 }
 0x532   :  { %3946 = vmatprep.mubr.msk.f32.mxu1 %vm38_vm0, %v5289_v26 }
 0x533   :  { %4090 = vmatpush3.bf16.msra.mxu1 %v4087_v6 }
 0x534   :  { %4092 = vmatprep.subr.bf16.mxu1 %v4091_v30  ;;  %3947 = vmatmul.mubr.msk.f32.gmra.mrb[18].mxu1 %vm38_vm0, %v5294_v22 }
 0x537   :  { %4094 = vmatpush3.bf16.msra.mxu1 %v4091_v30 }
 0x538   :  { %4096 = vmatprep.subr.bf16.mxu1 %v4095_v16 }
 0x53b   :  { %4098 = vmatpush3.bf16.msra.mxu1 %v4095_v16 }
 0x53c   :  { %4100 = vmatprep.subr.bf16.mxu1 %v4099_v12 }
 0x53f   :  { %4102 = vmatpush3.bf16.msra.mxu1 %v4099_v12 }
 0x540   :  { %4104 = vmatprep.subr.bf16.mxu1 %v4103_v38 }
 0x543   :  { %4106 = vmatpush3.bf16.msra.mxu1 %v4103_v38 }
 0x544   :  { %4108 = vmatprep.subr.bf16.mxu1 %v4107_v58 }
 0x547   :  { %4110 = vmatpush3.bf16.msra.mxu1 %v4107_v58 }
 0x548   :  { %4112 = vmatprep.subr.bf16.mxu1 %v4111_v7 }
 0x54b   :  { %4114 = vmatpush3.bf16.msra.mxu1 %v4111_v7 }
 0x601   :  { %v3945_v40 = vpop.f32.mrb[16].mxu1 }
 0x602   :  { %v3410_v41 = vadd.f32 %v3945_v40, %v3651_v50  ;;  %v3404_v5 = vpop.f32.mrb[17].mxu1 }
 0x603   :  { %v3405_v39 = vadd.f32 %v3651_v50, %v3404_v5 }
 0x604   :  { %v3424_v56 = vmax.f32 %v3410_v41, 0.0 }
 0x605   :  { %v3423_v8 = vmax.f32 %v3405_v39, 0.0 }
 0x607   :  { %3981 = vmatprep.mubr.f32.mxu1 %v3423_v8  ;;  %v3948_v61 = vpop.f32.mrb[18].mxu1 }
 0x608   :  { %3982 = vmatmul.mubr.f32.vlgmr.msra.gmra.mrb[20].mxu1 %v3424_v56  ;;  %v3420_v28 = vadd.f32 %v3948_v61, %v3651_v50  ;;  %v3414_v37 = vpop.f32.mrb[19].mxu1 }
 0x609   :  { %v3415_v35 = vadd.f32 %v3651_v50, %v3414_v37 }
 0x60a   :  { %v3426_v3 = vmax.f32 %v3420_v28, 0.0 }
 0x60b   :  { %v3425_v46 = vmax.f32 %v3415_v35, 0.0 }
 0x60d   :  { %3984 = vmatprep.mubr.f32.mxu1 %v3425_v46 }
 0x60e   :  { %3985 = vmatmul.mubr.f32.gmra.mrb[22].mxu1 %v3426_v3 }
 0x60f   :  { %4291 = shalt.err (!%p4288_p4)
}
 0x610   :  { %s4292_s2 = scalar_lea.hbm %s5372_s8, 256 }
 0x611   :  { %p4293_p5 = scmp.ne.s32.totalorder %s5372_s8, %s4292_s2  ;;  %p4296_p6 = scmp.lt.u32.totalorder %s4292_s2, %s5372_s8 }
 0x613   :  { %p4298_p7 = pnand %p4296_p6, %p4293_p5 }
 0x615   :  { %4301 = shalt.err (!%p4298_p7)
}
 0x616   :  { %s4341_s22 = smov 4   ;;  %v3656_v29 = vld [vmem:[%s5370_s6] ss:$0 sm:$0xff]  ;;  %s4342_s6 = smov [#allocation2]  }
 0x617   :  { %3570 = dma.vmem_to_hbm [thread:$0]  %s3565_s16, 256, %s5372_s8, [#allocation5], %s4331_s23, %s4331_s23, %s4341_s22  }
 0x618   :  { %s3552_s8 = sshll.u32 %s4342_s6, 4  ;;  %s3553_s8 = int_to_ptr.vmem [resolvable:$true] %s3552_s8 }
 0x619   :  { %s4302_s23 = scalar_lea.vmem %s3553_s8, 512  ;;  %p4307_p9 = scmp.lt.s32.totalorder %s3553_s8, %s3553_s8 }
 0x61a   :  { %p4303_p8 = scmp.ne.s32.totalorder %s3553_s8, %s4302_s23  ;;  %p4308_p10 = scmp.lt.s32.totalorder %s4302_s23, %s4302_s23 }
 0x61c   :  { %p4309_p11 = por %p4308_p10, %p4307_p9 }
 0x61e   :  { %p4310_p12 = pnand %p4309_p11, %p4303_p8 }
 0x6db   :  { %v3983_v33 = vpop.f32.mrb[20].mxu1 }
 0x6dc   :  { %v3522_v27 = vadd.f32 %v3983_v33, %v3656_v29  ;;  %v3516_v31 = vpop.f32.mrb[21].mxu1 }
 0x6dd   :  { %v3517_v1 = vadd.f32 %v3656_v29, %v3516_v31 }
 0x6de   :  { %v3536_v59 = vadd.f32 %v5268_v18, %v3522_v27 }
 0x6df   :  { %v3535_v36 = vadd.f32 %v5263_v14, %v3517_v1 }
 0x6e0   :  { %v3540_v4 = vmax.f32 %v3536_v59, 0.0 }
 0x6e1   :  { %v3539_v54 = vmax.f32 %v3535_v36, 0.0  ;;  %v3986_v23 = vpop.f32.mrb[22].mxu1 }
 0x6e2   :  { %3544 = vst.msk [vmem:[#allocation2 + $0x8] sm:$0xff] %vm38_vm0, %v3540_v4  ;;  %v3532_v32 = vadd.f32 %v3986_v23, %v3656_v29  ;;  %v3526_v60 = vpop.f32.mrb[23].mxu1 }
 0x6e3   :  { %3543 = vst.msk [vmem:[#allocation2] sm:$0xff] %vm38_vm0, %v3539_v54  ;;  %v3527_v9 = vadd.f32 %v3656_v29, %v3526_v60 }
 0x6e4   :  { %v3538_v53 = vadd.f32 %v5294_v22, %v3532_v32 }
 0x6e5   :  { %v3537_v44 = vadd.f32 %v5289_v26, %v3527_v9 }
 0x6e6   :  { %v3542_v48 = vmax.f32 %v3538_v53, 0.0 }
 0x6e7   :  { %v3541_v25 = vmax.f32 %v3537_v44, 0.0 }
 0x6e8   :  { %3546 = vst.msk [vmem:[#allocation2 + $0x18] sm:$0xff] %vm38_vm0, %v3542_v48 }
 0x6e9   :  { %3545 = vst.msk [vmem:[#allocation2 + $0x10] sm:$0xff] %vm38_vm0, %v3541_v25 }
 0x6ea   :  { %4313 = shalt.err (!%p4310_p12)
}
 0x6eb   :  { %s4314_s3 = scalar_lea.hbm %s5371_s7, 512 }
 0x6ec   :  { %p4315_p13 = scmp.ne.s32.totalorder %s5371_s7, %s4314_s3  ;;  %p4318_p0 = scmp.lt.u32.totalorder %s4314_s3, %s5371_s7 }
 0x6ee   :  { %p4320_p1 = pnand %p4318_p0, %p4315_p13 }
 0x6f0   :  { %4323 = shalt.err (!%p4320_p1)
}
 0x6f1   :  { %s4343_s11 = smov 128   ;;  %s4344_s12 = smov 8  }
 0x6f2   :  { %3558 = dma.vmem_to_hbm [thread:$0]  %s3553_s8, 512, %s5371_s7, [#allocation3], %s4343_s11, %s4343_s11, %s4344_s12  }
 0x6f3   :  { %4324 = dma.done.wait [#allocation3], 512  }
 0x6f4   :  { %4325 = vsyncadd [#allocation3], 4294966784 }
 0x6f5   :  { %4326 = dma.done.wait [#allocation5], 256  }
 0x6f6   :  { %4327 = vsyncadd [#allocation5], 4294967040 }
 0x6f7   :  { %3577 = vsyncpa [#allocation3], 1 }
 0x6f8   :  { %3578 = vsyncpa [#allocation5], 1 }

</bundles_post_ra>
